<compile_context>
chip_gen: v5e
topology: v5e:2x2
jax: 0.10.0
libtpu: 0.0.40
codegen_flags: <defaults>
</compile_context>

<pallas_src>
import functools

import jax
import jax.numpy as jnp
import numpy as np
from jax import lax
from jax.experimental import pallas as pl
from jax.experimental.pallas import tpu as pltpu


def _round_up(x, m):
    return ((x + m - 1) // m) * m


# ---------------------------------------------------------------------------
# Pallas kernels
# ---------------------------------------------------------------------------
def _conv_stats_kernel(p_ref, w_ref, o_ref, sum_ref, sq_ref, acc_ref):
    """K-blocked matmul with fused per-channel sum / sum-of-squares epilogue.

    grid = (M tiles ["parallel"], K tiles ["arbitrary"]).  acc_ref is an f32 VMEM
    accumulator.  Statistics are emitted per-M-tile (so the M axis stays parallel
    and megacore-friendly) and reduced to global batch stats in the wrapper.
    """
    k = pl.program_id(1)

    @pl.when(k == 0)
    def _():
        acc_ref[...] = jnp.zeros_like(acc_ref)

    acc_ref[...] += jnp.dot(p_ref[...], w_ref[...],
                            preferred_element_type=jnp.float32)

    @pl.when(k == pl.num_programs(1) - 1)
    def _():
        x = acc_ref[...]
        o_ref[...] = x.astype(o_ref.dtype)
        # Partial BN statistics in f32, straight from the f32 accumulator
        # (no extra HBM pass over the conv output).
        sum_ref[...] = jnp.sum(x, axis=0).reshape(1, 1, -1)
        sq_ref[...] = jnp.sum(x * x, axis=0).reshape(1, 1, -1)


def _bn_relu_kernel(x_ref, scale_ref, shift_ref, o_ref, *, relu):
    y = x_ref[...].astype(jnp.float32) * scale_ref[...] + shift_ref[...]
    if relu:
        y = jnp.maximum(y, 0.0)
    o_ref[...] = y.astype(o_ref.dtype)


# ---------------------------------------------------------------------------
# Wrapper (glue: im2col, padding, parameter reshape) -- jitted so the XLA glue
# (pad, slicing, stack, final transpose) fuses instead of doing extra HBM trips.
# ---------------------------------------------------------------------------
@functools.partial(
    jax.jit,
    static_argnames=("stride", "padding", "dilation", "relu", "bn", "eps",
                     "compute_dtype"))
def basic_conv(x, weight, gamma, beta, *, stride=1, padding=0, dilation=1,
               relu=True, bn=True, eps=1e-5, compute_dtype=jnp.float32):
    """x: (N, C, H, W) f32; weight: (OC, C, kh, kw); gamma/beta: (OC,).

    compute_dtype=jnp.bfloat16 feeds the MXU bf16 operands (f32 accumulation and
    f32 BN statistics preserved) for ~2x matmul throughput / half the DMA bytes.
    """
    # TODO(synk): groups > 1 and a conv bias are not implemented (module defaults:
    #             groups=1, bias=False). BatchNorm running-stat updates (momentum)
    #             do not affect the forward output and are omitted.
    N, C, H, W = x.shape
    OC, _, KH, KW = weight.shape
    OH = (H + 2 * padding - dilation * (KH - 1) - 1) // stride + 1
    OW = (W + 2 * padding - dilation * (KW - 1) - 1) // stride + 1
    M, K = N * OH * OW, C * KH * KW

    # ---- tile sizes / padded extents -----------------------------------------
    # Big M tiles keep the memory-bound passes near the HBM roofline (tile 512 ->
    # ~85% of roofline vs ~29% at 128); K is blocked at <=512 so the VMEM working
    # set stays well inside v7x's 64 MiB even for larger layers.
    TM = 512 if M > 512 else _round_up(M, 8)
    Mp = _round_up(M, TM)
    TK = 512 if K > 512 else _round_up(K, 128)
    Kp = _round_up(K, TK)
    OCp = _round_up(OC, 128)
    grid_m, grid_k = Mp // TM, Kp // TK
    # TODO(synk): block the OC axis too for very large out_planes (OCp >> 1024).

    # ---- im2col (XLA glue, fused under jit) -----------------------------------
    # One NCHW->NHWC transpose of the padded input, then strided slices stacked on
    # a trailing axis so K is ordered (c, kh, kw) -- matching the OIHW flatten.
    xp = jnp.pad(x, ((0, 0), (0, 0), (padding, padding), (padding, padding)))
    xp = jnp.transpose(xp, (0, 2, 3, 1))                        # (N, Hp, Wp, C)
    cols = []
    for i in range(KH):
        for j in range(KW):
            hi, wi = i * dilation, j * dilation
            cols.append(xp[:, hi:hi + (OH - 1) * stride + 1:stride,
                              wi:wi + (OW - 1) * stride + 1:stride, :])  # (N,OH,OW,C)
    pat = jnp.stack(cols, axis=-1)                              # (N,OH,OW,C,KH*KW)
    pat = pat.reshape(M, K).astype(compute_dtype)
    pat_p = jnp.pad(pat, ((0, Mp - M), (0, Kp - K)))

    w_flat = jnp.transpose(weight.reshape(OC, K)).astype(compute_dtype)  # (K, OC)
    w_p = jnp.pad(w_flat, ((0, Kp - K), (0, OCp - OC)))

    vmem_params = dict(vmem_limit_bytes=48 * 1024 * 1024)

    # ---- 1) convolution matmul + fused BN-statistics epilogue -----------------
    conv_out, psum, psq = pl.pallas_call(
        _conv_stats_kernel,
        out_shape=(jax.ShapeDtypeStruct((Mp, OCp), compute_dtype),
                   jax.ShapeDtypeStruct((grid_m, 1, OCp), jnp.float32),
                   jax.ShapeDtypeStruct((grid_m, 1, OCp), jnp.float32)),
        grid=(grid_m, grid_k),
        in_specs=[pl.BlockSpec((TM, TK), lambda i, k: (i, k)),
                  pl.BlockSpec((TK, OCp), lambda i, k: (k, 0))],
        out_specs=(pl.BlockSpec((TM, OCp), lambda i, k: (i, 0)),
                   pl.BlockSpec((1, 1, OCp), lambda i, k: (i, 0, 0)),
                   pl.BlockSpec((1, 1, OCp), lambda i, k: (i, 0, 0))),
        scratch_shapes=[pltpu.VMEM((TM, OCp), jnp.float32)],
        compiler_params=pltpu.CompilerParams(
            dimension_semantics=("parallel", "arbitrary"), **vmem_params),
    )(pat_p, w_p)

    # ---- 2) batch-norm scale/shift from batch statistics (tiny scalar JAX) ----
    if bn:
        ch_sum = jnp.sum(psum, axis=0)                          # (1, OCp)
        ch_sq = jnp.sum(psq, axis=0)
        mean = ch_sum / M
        # NOTE: E[x^2]-E[x]^2 in f32 can lose precision for large-mean activations;
        # accepted (training-mode BN on roughly zero-mean conv outputs), clamped >= 0.
        var = jnp.maximum(ch_sq / M - mean * mean, 0.0)         # biased variance
        gamma_p = jnp.pad(gamma.astype(jnp.float32).reshape(1, OC),
                          ((0, 0), (0, OCp - OC)))
        beta_p = jnp.pad(beta.astype(jnp.float32).reshape(1, OC),
                         ((0, 0), (0, OCp - OC)))
        scale = gamma_p * lax.rsqrt(var + eps)
        shift = beta_p - mean * scale
    else:
        scale = jnp.ones((1, OCp), jnp.float32)
        shift = jnp.zeros((1, OCp), jnp.float32)

    # ---- 3) fused BN-affine + ReLU (in place over conv_out when dtypes match) --
    alias = {0: 0} if jnp.dtype(compute_dtype) == jnp.dtype(jnp.float32) else {}
    out = pl.pallas_call(
        functools.partial(_bn_relu_kernel, relu=relu),
        out_shape=jax.ShapeDtypeStruct((Mp, OCp), jnp.float32),
        grid=(grid_m,),
        in_specs=[pl.BlockSpec((TM, OCp), lambda i: (i, 0)),
                  pl.BlockSpec((1, OCp), lambda i: (0, 0)),
                  pl.BlockSpec((1, OCp), lambda i: (0, 0))],
        out_specs=pl.BlockSpec((TM, OCp), lambda i: (i, 0)),
        input_output_aliases=alias,
        compiler_params=pltpu.CompilerParams(
            dimension_semantics=("parallel",), **vmem_params),
    )(conv_out, scale, shift)

    # ---- back to NCHW (single fused slice+reshape+transpose under jit) ---------
    # TODO(synk): return NHWC directly if downstream consumers accept it; NCHW kept
    #             here to match the PyTorch module's output layout exactly.
    out = out[:M, :OC].reshape(N, OH, OW, OC).transpose(0, 3, 1, 2)
    return out


# ---------------------------------------------------------------------------
# Pure-JAX reference (for correctness check)
# ---------------------------------------------------------------------------
def basic_conv_ref(x, weight, gamma, beta, *, stride=1, padding=0, dilation=1,
                   relu=True, bn=True, eps=1e-5):
    y = lax.conv_general_dilated(
        x, weight, window_strides=(stride, stride),
        padding=((padding, padding), (padding, padding)),
        rhs_dilation=(dilation, dilation),
        dimension_numbers=("NCHW", "OIHW", "NCHW"))
    if bn:
        mean = jnp.mean(y, axis=(0, 2, 3), keepdims=True)
        var = jnp.var(y, axis=(0, 2, 3), keepdims=True)  # biased
        y = (y - mean) * lax.rsqrt(var + eps)
        y = y * gamma.reshape(1, -1, 1, 1) + beta.reshape(1, -1, 1, 1)
    if relu:
        y = jnp.maximum(y, 0.0)
    return y


if __name__ == "__main__":
    # BasicConv(in_planes=4, out_planes=8, kernel_size=3, stride=1, padding=1)
    N, C, H, W = 2, 4, 16, 16
    OC, KH, KW = 8, 3, 3
    stride, padding, dilation = 1, 1, 1

    key = jax.random.PRNGKey(0)
    kx, kw = jax.random.split(key)
    x = jax.random.normal(kx, (N, C, H, W), dtype=jnp.float32)
    weight = jax.random.normal(kw, (OC, C, KH, KW), dtype=jnp.float32) * 0.1
    gamma = jnp.ones((OC,), jnp.float32)   # BatchNorm2d default init
    beta = jnp.zeros((OC,), jnp.float32)

    ref = basic_conv_ref(x, weight, gamma, beta,
                         stride=stride, padding=padding, dilation=dilation,
                         relu=True, bn=True)

    # f32 MXU path: bit-level match (tight tolerance) with the f32 reference.
    out_f32 = basic_conv(x, weight, gamma, beta,
                         stride=stride, padding=padding, dilation=dilation,
                         relu=True, bn=True, compute_dtype=jnp.float32)
    out_f32 = jax.block_until_ready(out_f32)
    np.testing.assert_allclose(np.asarray(out_f32), np.asarray(ref),
                               atol=1e-4, rtol=1e-4)

    # bf16 MXU path (perf mode): f32 accumulation/statistics, looser tolerance.
    out_bf16 = basic_conv(x, weight, gamma, beta,
                          stride=stride, padding=padding, dilation=dilation,
                          relu=True, bn=True, compute_dtype=jnp.bfloat16)
    out_bf16 = jax.block_until_ready(out_bf16)
    np.testing.assert_allclose(np.asarray(out_bf16), np.asarray(ref),
                               atol=3e-2, rtol=3e-2)

    print("KERNEL_OK")
</pallas_src>

<mosaic_0001>
module attributes {stable_mosaic.version = 11 : i64} {
  func.func @_conv_stats_kernel(%arg0: i32, %arg1: i32, %arg2: memref<512x128xf32, #tpu.memory_space<vmem>>, %arg3: memref<128x128xf32, #tpu.memory_space<vmem>>, %arg4: memref<512x128xf32, #tpu.memory_space<vmem>>, %arg5: memref<1x1x128xf32, #tpu.memory_space<vmem>>, %arg6: memref<1x1x128xf32, #tpu.memory_space<vmem>>, %arg7: memref<512x128xf32, #tpu.memory_space<vmem>>) attributes {dimension_semantics = [#tpu.dimension_semantics<parallel>, #tpu.dimension_semantics<arbitrary>], iteration_bounds = array<i64: 1, 1>, scalar_prefetch = 0 : i64, scratch_operands = 1 : i64, tpu.core_type = #tpu.core_type<tc>, window_params = [{transform_indices = @transform_0, window_bounds = array<i64: 512, 128>}, {transform_indices = @transform_1, window_bounds = array<i64: 128, 128>}, {transform_indices = @transform_2, window_bounds = array<i64: 512, 128>}, {transform_indices = @transform_3, window_bounds = array<i64: 1, 1, 128>}, {transform_indices = @transform_4, window_bounds = array<i64: 1, 1, 128>}]} {
    %c0_i32 = arith.constant 0 : i32
    %0 = arith.cmpi eq, %arg1, %c0_i32 : i32
    %1 = arith.extui %0 : i1 to i32
    %c0_i32_0 = arith.constant 0 : i32
    %2 = arith.cmpi ne, %1, %c0_i32_0 : i32
    scf.if %2 {
      %cst_10 = arith.constant 0.000000e+00 : f32
      %12 = vector.broadcast %cst_10 : f32 to vector<512x128xf32>
      %c0_11 = arith.constant 0 : index
      %c0_12 = arith.constant 0 : index
      %13 = vector.load %arg7[%c0_11, %c0_12] : memref<512x128xf32, #tpu.memory_space<vmem>>, vector<512x128xf32>
      tpu.vector_store %arg7[%c0_11, %c0_12], %12 {strides = array<i32>} : memref<512x128xf32, #tpu.memory_space<vmem>>, vector<512x128xf32>,
    } else {
    }
    %c0 = arith.constant 0 : index
    %c0_1 = arith.constant 0 : index
    %3 = vector.load %arg7[%c0, %c0_1] : memref<512x128xf32, #tpu.memory_space<vmem>>, vector<512x128xf32>
    %c0_2 = arith.constant 0 : index
    %c0_3 = arith.constant 0 : index
    %4 = vector.load %arg2[%c0_2, %c0_3] : memref<512x128xf32, #tpu.memory_space<vmem>>, vector<512x128xf32>
    %c0_4 = arith.constant 0 : index
    %c0_5 = arith.constant 0 : index
    %5 = vector.load %arg3[%c0_4, %c0_5] : memref<128x128xf32, #tpu.memory_space<vmem>>, vector<128x128xf32>
    %cst = arith.constant dense<0.000000e+00> : vector<512x128xf32>
    %6 = tpu.matmul %4, %5, %cst {dimension_numbers = #tpu.dot_dimension_numbers<[1], [0], [0], [1], [0, 0, 1, 1], [], []>} : vector<512x128xf32>, vector<128x128xf32>, vector<512x128xf32> -> vector<512x128xf32>
    %7 = arith.addf %3, %6 : vector<512x128xf32>
    %c0_6 = arith.constant 0 : index
    %c0_7 = arith.constant 0 : index
    %8 = vector.load %arg7[%c0_6, %c0_7] : memref<512x128xf32, #tpu.memory_space<vmem>>, vector<512x128xf32>
    tpu.vector_store %arg7[%c0_6, %c0_7], %7 {strides = array<i32>} : memref<512x128xf32, #tpu.memory_space<vmem>>, vector<512x128xf32>,
    %c0_i32_8 = arith.constant 0 : i32
    %9 = arith.cmpi eq, %arg1, %c0_i32_8 : i32
    %10 = arith.extui %9 : i1 to i32
    %c0_i32_9 = arith.constant 0 : i32
    %11 = arith.cmpi ne, %10, %c0_i32_9 : i32
    scf.if %11 {
      %c0_10 = arith.constant 0 : index
      %c0_11 = arith.constant 0 : index
      %12 = vector.load %arg7[%c0_10, %c0_11] : memref<512x128xf32, #tpu.memory_space<vmem>>, vector<512x128xf32>
      %c0_12 = arith.constant 0 : index
      %c0_13 = arith.constant 0 : index
      %13 = vector.load %arg4[%c0_12, %c0_13] : memref<512x128xf32, #tpu.memory_space<vmem>>, vector<512x128xf32>
      tpu.vector_store %arg4[%c0_12, %c0_13], %12 {strides = array<i32>} : memref<512x128xf32, #tpu.memory_space<vmem>>, vector<512x128xf32>,
      %cst_14 = arith.constant dense<0.000000e+00> : vector<128xf32>
      %14 = vector.multi_reduction <add>, %12, %cst_14 [0] : vector<512x128xf32> to vector<128xf32>
      %15 = vector.shape_cast %14 : vector<128xf32> to vector<1x1x128xf32>
      %c0_15 = arith.constant 0 : index
      %c0_16 = arith.constant 0 : index
      %c0_17 = arith.constant 0 : index
      %16 = vector.load %arg5[%c0_15, %c0_16, %c0_17] : memref<1x1x128xf32, #tpu.memory_space<vmem>>, vector<1x1x128xf32>
      tpu.vector_store %arg5[%c0_15, %c0_16, %c0_17], %15 {strides = array<i32>} : memref<1x1x128xf32, #tpu.memory_space<vmem>>, vector<1x1x128xf32>,
      %17 = arith.mulf %12, %12 : vector<512x128xf32>
      %cst_18 = arith.constant dense<0.000000e+00> : vector<128xf32>
      %18 = vector.multi_reduction <add>, %17, %cst_18 [0] : vector<512x128xf32> to vector<128xf32>
      %19 = vector.shape_cast %18 : vector<128xf32> to vector<1x1x128xf32>
      %c0_19 = arith.constant 0 : index
      %c0_20 = arith.constant 0 : index
      %c0_21 = arith.constant 0 : index
      %20 = vector.load %arg6[%c0_19, %c0_20, %c0_21] : memref<1x1x128xf32, #tpu.memory_space<vmem>>, vector<1x1x128xf32>
      tpu.vector_store %arg6[%c0_19, %c0_20, %c0_21], %19 {strides = array<i32>} : memref<1x1x128xf32, #tpu.memory_space<vmem>>, vector<1x1x128xf32>,
    } else {
    }
    return
  }
  func.func @transform_0(%arg0: i32, %arg1: i32) -> (i32, i32) {
    %c0_i32 = arith.constant 0 : i32
    return %arg0, %arg1 : i32, i32
  }
  func.func @transform_1(%arg0: i32, %arg1: i32) -> (i32, i32) {
    %c0_i32 = arith.constant 0 : i32
    %c0_i32_0 = arith.constant 0 : i32
    return %arg1, %c0_i32 : i32, i32
  }
  func.func @transform_2(%arg0: i32, %arg1: i32) -> (i32, i32) {
    %c0_i32 = arith.constant 0 : i32
    %c0_i32_0 = arith.constant 0 : i32
    return %arg0, %c0_i32 : i32, i32
  }
  func.func @transform_3(%arg0: i32, %arg1: i32) -> (i32, i32, i32) {
    %c0_i32 = arith.constant 0 : i32
    %c0_i32_0 = arith.constant 0 : i32
    %c0_i32_1 = arith.constant 0 : i32
    return %arg0, %c0_i32, %c0_i32_0 : i32, i32, i32
  }
  func.func @transform_4(%arg0: i32, %arg1: i32) -> (i32, i32, i32) {
    %c0_i32 = arith.constant 0 : i32
    %c0_i32_0 = arith.constant 0 : i32
    %c0_i32_1 = arith.constant 0 : i32
    return %arg0, %c0_i32, %c0_i32_0 : i32, i32, i32
  }
}

module attributes {stable_mosaic.version = 11 : i64} {
  func.func @_bn_relu_kernel(%arg0: i32, %arg1: memref<512x128xf32, #tpu.memory_space<vmem>>, %arg2: memref<1x128xf32, #tpu.memory_space<vmem>>, %arg3: memref<1x128xf32, #tpu.memory_space<vmem>>, %arg4: memref<512x128xf32, #tpu.memory_space<vmem>>) attributes {dimension_semantics = [#tpu.dimension_semantics<parallel>], iteration_bounds = array<i64: 1>, scalar_prefetch = 0 : i64, scratch_operands = 0 : i64, tpu.core_type = #tpu.core_type<tc>, window_params = [{transform_indices = @transform_0, window_bounds = array<i64: 512, 128>}, {pipeline_mode = #tpu.pipeline_mode<synchronous>, transform_indices = @transform_1, window_bounds = array<i64: 1, 128>}, {pipeline_mode = #tpu.pipeline_mode<synchronous>, transform_indices = @transform_2, window_bounds = array<i64: 1, 128>}, {transform_indices = @transform_3, window_bounds = array<i64: 512, 128>}]} {
    %c0 = arith.constant 0 : index
    %c0_0 = arith.constant 0 : index
    %0 = vector.load %arg1[%c0, %c0_0] : memref<512x128xf32, #tpu.memory_space<vmem>>, vector<512x128xf32>
    %c0_1 = arith.constant 0 : index
    %c0_2 = arith.constant 0 : index
    %1 = vector.load %arg2[%c0_1, %c0_2] : memref<1x128xf32, #tpu.memory_space<vmem>>, vector<1x128xf32>
    %2 = vector.broadcast %1 : vector<1x128xf32> to vector<512x128xf32>
    %3 = arith.mulf %0, %2 : vector<512x128xf32>
    %c0_3 = arith.constant 0 : index
    %c0_4 = arith.constant 0 : index
    %4 = vector.load %arg3[%c0_3, %c0_4] : memref<1x128xf32, #tpu.memory_space<vmem>>, vector<1x128xf32>
    %5 = vector.broadcast %4 : vector<1x128xf32> to vector<512x128xf32>
    %6 = arith.addf %3, %5 : vector<512x128xf32>
    %cst = arith.constant 0.000000e+00 : f32
    %7 = vector.broadcast %cst : f32 to vector<512x128xf32>
    %8 = arith.maximumf %6, %7 : vector<512x128xf32>
    %c0_5 = arith.constant 0 : index
    %c0_6 = arith.constant 0 : index
    %9 = vector.load %arg4[%c0_5, %c0_6] : memref<512x128xf32, #tpu.memory_space<vmem>>, vector<512x128xf32>
    tpu.vector_store %arg4[%c0_5, %c0_6], %8 {strides = array<i32>} : memref<512x128xf32, #tpu.memory_space<vmem>>, vector<512x128xf32>,
    return
  }
  func.func @transform_0(%arg0: i32) -> (i32, i32) {
    %c0_i32 = arith.constant 0 : i32
    %c0_i32_0 = arith.constant 0 : i32
    return %arg0, %c0_i32 : i32, i32
  }
  func.func @transform_1(%arg0: i32) -> (i32, i32) {
    %c0_i32 = arith.constant 0 : i32
    %c0_i32_0 = arith.constant 0 : i32
    %c0_i32_1 = arith.constant 0 : i32
    return %c0_i32, %c0_i32_0 : i32, i32
  }
  func.func @transform_2(%arg0: i32) -> (i32, i32) {
    %c0_i32 = arith.constant 0 : i32
    %c0_i32_0 = arith.constant 0 : i32
    %c0_i32_1 = arith.constant 0 : i32
    return %c0_i32, %c0_i32_0 : i32, i32
  }
  func.func @transform_3(%arg0: i32) -> (i32, i32) {
    %c0_i32 = arith.constant 0 : i32
    %c0_i32_0 = arith.constant 0 : i32
    return %arg0, %c0_i32 : i32, i32
  }
}

</mosaic_0001>

<bundles_post_ra>
// kernel: basic_conv.3
= control target key start
LH: loop header
LB: loop body
LE: loop exit
PB: predicated region body
PF: predicated region fallthrough
CT: control target
= control target key end

     0   :  { %s893_s0 = inlined_call_operand.vmem [shape: f32[512,128], index: 0, kind: input, shape index: {}, may-alias: {0,3}]   ;;  %s894_s1 = inlined_call_operand.vmem [shape: f32[1,128], index: 1, kind: input, shape index: {}]   ;;  %s895_s2 = inlined_call_operand.vmem [shape: f32[1,128], index: 2, kind: input, shape index: {}]   ;;  %s896_s3 = inlined_call_operand.vmem [shape: f32[512,128], index: 3, kind: output, shape index: {}, may-alias: {0,3}]  }
   0x1   :  { %v14_v0 = vld [vmem:[%s893_s0] sm:$0xff]  ;;  %v15_v3 = vld [vmem:[%s893_s0 + $0x8] sm:$0xff]  ;;  %v16_v6 = vld [vmem:[%s893_s0 + $0x10] sm:$0xff] }
   0x2   :  { %v374_v1 = vld [vmem:[%s894_s1] ss:$0 sm:$0xff]  ;;  %v17_v7 = vld [vmem:[%s893_s0 + $0x18] sm:$0xff]  ;;  %v19_v12 = vld [vmem:[%s893_s0 + $0x28] sm:$0xff] }
   0x3   :  { %v379_v2 = vld [vmem:[%s895_s2] ss:$0 sm:$0xff]  ;;  %v82_v4 = vmul.f32 %v374_v1, %v14_v0  ;;  %v83_v5 = vmul.f32 %v374_v1, %v15_v3  ;;  %v84_v9 = vmul.f32 %v374_v1, %v16_v6  ;;  %v85_v10 = vmul.f32 %v374_v1, %v17_v7  ;;  %v20_v13 = vld [vmem:[%s893_s0 + $0x30] sm:$0xff]  ;;  %v21_v14 = vld [vmem:[%s893_s0 + $0x38] sm:$0xff] }
   0x4   :  { %v18_v8 = vld [vmem:[%s893_s0 + $0x20] sm:$0xff]  ;;  %v87_v17 = vmul.f32 %v374_v1, %v19_v12  ;;  %v88_v18 = vmul.f32 %v374_v1, %v20_v13  ;;  %v89_v22 = vmul.f32 %v374_v1, %v21_v14  ;;  %v23_v24 = vld [vmem:[%s893_s0 + $0x48] sm:$0xff]  ;;  %v24_v29 = vld [vmem:[%s893_s0 + $0x50] sm:$0xff] }
   0x5   :  { %v86_v11 = vmul.f32 %v374_v1, %v18_v8  ;;  %v150_v15 = vadd.f32 %v379_v2, %v82_v4  ;;  %v151_v16 = vadd.f32 %v379_v2, %v83_v5  ;;  %v152_v19 = vadd.f32 %v379_v2, %v84_v9  ;;  %v22_v23 = vld [vmem:[%s893_s0 + $0x40] sm:$0xff]  ;;  %v25_v30 = vld [vmem:[%s893_s0 + $0x58] sm:$0xff]  ;;  %v27_v35 = vld [vmem:[%s893_s0 + $0x68] sm:$0xff] }
   0x6   :  { %v153_v20 = vadd.f32 %v379_v2, %v85_v10  ;;  %v155_v27 = vadd.f32 %v379_v2, %v87_v17  ;;  %v156_v28 = vadd.f32 %v379_v2, %v88_v18  ;;  %v26_v31 = vld [vmem:[%s893_s0 + $0x60] sm:$0xff]  ;;  %v157_v34 = vadd.f32 %v379_v2, %v89_v22  ;;  %v28_v36 = vld [vmem:[%s893_s0 + $0x70] sm:$0xff] }
   0x7   :  { %v154_v21 = vadd.f32 %v379_v2, %v86_v11  ;;  %v214_v25 = vmax.f32 %v150_v15, 0.0  ;;  %v215_v26 = vmax.f32 %v151_v16, 0.0  ;;  %v216_v32 = vmax.f32 %v152_v19, 0.0 }
   0x8   :  { %v217_v33 = vmax.f32 %v153_v20, 0.0  ;;  %v219_v38 = vmax.f32 %v155_v27, 0.0  ;;  %v90_v39 = vmul.f32 %v374_v1, %v22_v23  ;;  %v91_v40 = vmul.f32 %v374_v1, %v23_v24 }
   0x9   :  { %278 = vst [vmem:[%s896_s3] sm:$0xff] %v214_v25  ;;  %v218_v37 = vmax.f32 %v154_v21, 0.0  ;;  %v220_v42 = vmax.f32 %v156_v28, 0.0  ;;  %v92_v43 = vmul.f32 %v374_v1, %v24_v29  ;;  %v93_v44 = vmul.f32 %v374_v1, %v25_v30 }
   0xa   :  { %v94_v45 = vmul.f32 %v374_v1, %v26_v31  ;;  %v158_v46 = vadd.f32 %v379_v2, %v90_v39  ;;  %v159_v47 = vadd.f32 %v379_v2, %v91_v40  ;;  %v95_v48 = vmul.f32 %v374_v1, %v27_v35 }
   0xb   :  { %v96_v49 = vmul.f32 %v374_v1, %v28_v36  ;;  %v221_v50 = vmax.f32 %v157_v34, 0.0  ;;  %v160_v51 = vadd.f32 %v379_v2, %v92_v43  ;;  %v161_v52 = vadd.f32 %v379_v2, %v93_v44 }
   0xc   :  { %v222_v56 = vmax.f32 %v158_v46, 0.0  ;;  %v162_v57 = vadd.f32 %v379_v2, %v94_v45  ;;  %v223_v60 = vmax.f32 %v159_v47, 0.0  ;;  %v163_v61 = vadd.f32 %v379_v2, %v95_v48 }
   0xd   :  { %v224_v63 = vmax.f32 %v160_v51, 0.0  ;;  %v164_v0 = vadd.f32 %v379_v2, %v96_v49  ;;  %v225_v6 = vmax.f32 %v161_v52, 0.0 }
   0xe   :  { %v226_v11 = vmax.f32 %v162_v57, 0.0  ;;  %v227_v15 = vmax.f32 %v163_v61, 0.0 }
   0xf   :  { %v228_v19 = vmax.f32 %v164_v0, 0.0 }
  0x10   :  { %v29_v41 = vld [vmem:[%s893_s0 + $0x78] sm:$0xff] }
  0x11   :  { %279 = vst [vmem:[%s896_s3 + $0x8] sm:$0xff] %v215_v26  ;;  %v97_v53 = vmul.f32 %v374_v1, %v29_v41 }
  0x12   :  { %280 = vst [vmem:[%s896_s3 + $0x10] sm:$0xff] %v216_v32 }
  0x13   :  { %281 = vst [vmem:[%s896_s3 + $0x18] sm:$0xff] %v217_v33  ;;  %v165_v7 = vadd.f32 %v379_v2, %v97_v53 }
  0x15   :  { %v229_v23 = vmax.f32 %v165_v7, 0.0 }
  0x1a   :  { %v30_v54 = vld [vmem:[%s893_s0 + $0x80] sm:$0xff]  ;;  %v31_v55 = vld [vmem:[%s893_s0 + $0x88] sm:$0xff] }
  0x1b   :  { %282 = vst [vmem:[%s896_s3 + $0x20] sm:$0xff] %v218_v37  ;;  %v98_v3 = vmul.f32 %v374_v1, %v30_v54  ;;  %v99_v4 = vmul.f32 %v374_v1, %v31_v55 }
  0x1d   :  { %v166_v12 = vadd.f32 %v379_v2, %v98_v3  ;;  %v167_v16 = vadd.f32 %v379_v2, %v99_v4 }
  0x1f   :  { %v230_v27 = vmax.f32 %v166_v12, 0.0  ;;  %v231_v31 = vmax.f32 %v167_v16, 0.0 }
  0x22   :  { %v32_v58 = vld [vmem:[%s893_s0 + $0x90] sm:$0xff]  ;;  %v33_v59 = vld [vmem:[%s893_s0 + $0x98] sm:$0xff] }
  0x23   :  { %283 = vst [vmem:[%s896_s3 + $0x28] sm:$0xff] %v219_v38  ;;  %v100_v8 = vmul.f32 %v374_v1, %v32_v58  ;;  %v101_v9 = vmul.f32 %v374_v1, %v33_v59 }
  0x25   :  { %v168_v20 = vadd.f32 %v379_v2, %v100_v8  ;;  %v169_v24 = vadd.f32 %v379_v2, %v101_v9 }
  0x27   :  { %v232_v35 = vmax.f32 %v168_v20, 0.0  ;;  %v233_v39 = vmax.f32 %v169_v24, 0.0 }
  0x2a   :  { %v34_v62 = vld [vmem:[%s893_s0 + $0xa0] sm:$0xff] }
  0x2b   :  { %284 = vst [vmem:[%s896_s3 + $0x30] sm:$0xff] %v220_v42  ;;  %v102_v13 = vmul.f32 %v374_v1, %v34_v62 }
  0x2d   :  { %v170_v28 = vadd.f32 %v379_v2, %v102_v13 }
  0x2f   :  { %v234_v43 = vmax.f32 %v170_v28, 0.0 }
  0x32   :  { %v35_v5 = vld [vmem:[%s893_s0 + $0xa8] sm:$0xff] }
  0x33   :  { %285 = vst [vmem:[%s896_s3 + $0x38] sm:$0xff] %v221_v50  ;;  %v103_v17 = vmul.f32 %v374_v1, %v35_v5 }
  0x35   :  { %v171_v32 = vadd.f32 %v379_v2, %v103_v17 }
  0x37   :  { %v235_v47 = vmax.f32 %v171_v32, 0.0 }
  0x3a   :  { %v36_v10 = vld [vmem:[%s893_s0 + $0xb0] sm:$0xff] }
  0x3b   :  { %286 = vst [vmem:[%s896_s3 + $0x40] sm:$0xff] %v222_v56  ;;  %v104_v21 = vmul.f32 %v374_v1, %v36_v10 }
  0x3d   :  { %v172_v36 = vadd.f32 %v379_v2, %v104_v21 }
  0x3f   :  { %v236_v51 = vmax.f32 %v172_v36, 0.0 }
  0x42   :  { %v37_v14 = vld [vmem:[%s893_s0 + $0xb8] sm:$0xff] }
  0x43   :  { %287 = vst [vmem:[%s896_s3 + $0x48] sm:$0xff] %v223_v60  ;;  %v105_v25 = vmul.f32 %v374_v1, %v37_v14 }
  0x45   :  { %v173_v40 = vadd.f32 %v379_v2, %v105_v25 }
  0x47   :  { %v237_v55 = vmax.f32 %v173_v40, 0.0 }
  0x4a   :  { %v38_v18 = vld [vmem:[%s893_s0 + $0xc0] sm:$0xff] }
  0x4b   :  { %288 = vst [vmem:[%s896_s3 + $0x50] sm:$0xff] %v224_v63  ;;  %v106_v29 = vmul.f32 %v374_v1, %v38_v18 }
  0x4d   :  { %v174_v44 = vadd.f32 %v379_v2, %v106_v29 }
  0x4f   :  { %v238_v59 = vmax.f32 %v174_v44, 0.0 }
  0x52   :  { %v39_v22 = vld [vmem:[%s893_s0 + $0xc8] sm:$0xff] }
  0x53   :  { %289 = vst [vmem:[%s896_s3 + $0x58] sm:$0xff] %v225_v6  ;;  %v107_v33 = vmul.f32 %v374_v1, %v39_v22 }
  0x55   :  { %v175_v48 = vadd.f32 %v379_v2, %v107_v33 }
  0x57   :  { %v239_v63 = vmax.f32 %v175_v48, 0.0 }
  0x5a   :  { %v40_v26 = vld [vmem:[%s893_s0 + $0xd0] sm:$0xff] }
  0x5b   :  { %290 = vst [vmem:[%s896_s3 + $0x60] sm:$0xff] %v226_v11  ;;  %v108_v37 = vmul.f32 %v374_v1, %v40_v26 }
  0x5d   :  { %v176_v52 = vadd.f32 %v379_v2, %v108_v37 }
  0x5f   :  { %v240_v5 = vmax.f32 %v176_v52, 0.0 }
  0x62   :  { %v41_v30 = vld [vmem:[%s893_s0 + $0xd8] sm:$0xff] }
  0x63   :  { %291 = vst [vmem:[%s896_s3 + $0x68] sm:$0xff] %v227_v15  ;;  %v109_v41 = vmul.f32 %v374_v1, %v41_v30 }
  0x65   :  { %v177_v56 = vadd.f32 %v379_v2, %v109_v41 }
  0x67   :  { %v241_v9 = vmax.f32 %v177_v56, 0.0 }
  0x6a   :  { %v42_v34 = vld [vmem:[%s893_s0 + $0xe0] sm:$0xff] }
  0x6b   :  { %292 = vst [vmem:[%s896_s3 + $0x70] sm:$0xff] %v228_v19  ;;  %v110_v45 = vmul.f32 %v374_v1, %v42_v34 }
  0x6d   :  { %v178_v60 = vadd.f32 %v379_v2, %v110_v45 }
  0x6f   :  { %v242_v13 = vmax.f32 %v178_v60, 0.0 }
  0x72   :  { %v43_v38 = vld [vmem:[%s893_s0 + $0xe8] sm:$0xff] }
  0x73   :  { %293 = vst [vmem:[%s896_s3 + $0x78] sm:$0xff] %v229_v23  ;;  %v111_v49 = vmul.f32 %v374_v1, %v43_v38 }
  0x75   :  { %v179_v0 = vadd.f32 %v379_v2, %v111_v49 }
  0x77   :  { %v243_v17 = vmax.f32 %v179_v0, 0.0 }
  0x7a   :  { %v44_v42 = vld [vmem:[%s893_s0 + $0xf0] sm:$0xff] }
  0x7b   :  { %294 = vst [vmem:[%s896_s3 + $0x80] sm:$0xff] %v230_v27  ;;  %v112_v53 = vmul.f32 %v374_v1, %v44_v42 }
  0x7d   :  { %v180_v6 = vadd.f32 %v379_v2, %v112_v53 }
  0x7f   :  { %v244_v21 = vmax.f32 %v180_v6, 0.0 }
  0x82   :  { %v45_v46 = vld [vmem:[%s893_s0 + $0xf8] sm:$0xff] }
  0x83   :  { %295 = vst [vmem:[%s896_s3 + $0x88] sm:$0xff] %v231_v31  ;;  %v113_v57 = vmul.f32 %v374_v1, %v45_v46 }
  0x85   :  { %v181_v10 = vadd.f32 %v379_v2, %v113_v57 }
  0x87   :  { %v245_v25 = vmax.f32 %v181_v10, 0.0 }
  0x8a   :  { %v46_v50 = vld [vmem:[%s893_s0 + $0x100] sm:$0xff] }
  0x8b   :  { %296 = vst [vmem:[%s896_s3 + $0x90] sm:$0xff] %v232_v35  ;;  %v114_v61 = vmul.f32 %v374_v1, %v46_v50 }
  0x8d   :  { %v182_v14 = vadd.f32 %v379_v2, %v114_v61 }
  0x8f   :  { %v246_v29 = vmax.f32 %v182_v14, 0.0 }
  0x92   :  { %v47_v54 = vld [vmem:[%s893_s0 + $0x108] sm:$0xff] }
  0x93   :  { %297 = vst [vmem:[%s896_s3 + $0x98] sm:$0xff] %v233_v39  ;;  %v115_v3 = vmul.f32 %v374_v1, %v47_v54 }
  0x95   :  { %v183_v18 = vadd.f32 %v379_v2, %v115_v3 }
  0x97   :  { %v247_v33 = vmax.f32 %v183_v18, 0.0 }
  0x9a   :  { %v48_v58 = vld [vmem:[%s893_s0 + $0x110] sm:$0xff] }
  0x9b   :  { %298 = vst [vmem:[%s896_s3 + $0xa0] sm:$0xff] %v234_v43  ;;  %v116_v7 = vmul.f32 %v374_v1, %v48_v58 }
  0x9d   :  { %v184_v22 = vadd.f32 %v379_v2, %v116_v7 }
  0x9f   :  { %v248_v37 = vmax.f32 %v184_v22, 0.0 }
  0xa2   :  { %v49_v62 = vld [vmem:[%s893_s0 + $0x118] sm:$0xff] }
  0xa3   :  { %299 = vst [vmem:[%s896_s3 + $0xa8] sm:$0xff] %v235_v47  ;;  %v117_v11 = vmul.f32 %v374_v1, %v49_v62 }
  0xa5   :  { %v185_v26 = vadd.f32 %v379_v2, %v117_v11 }
  0xa7   :  { %v249_v41 = vmax.f32 %v185_v26, 0.0 }
  0xaa   :  { %v50_v4 = vld [vmem:[%s893_s0 + $0x120] sm:$0xff] }
  0xab   :  { %300 = vst [vmem:[%s896_s3 + $0xb0] sm:$0xff] %v236_v51  ;;  %v118_v15 = vmul.f32 %v374_v1, %v50_v4 }
  0xad   :  { %v186_v30 = vadd.f32 %v379_v2, %v118_v15 }
  0xaf   :  { %v250_v45 = vmax.f32 %v186_v30, 0.0 }
  0xb2   :  { %v51_v8 = vld [vmem:[%s893_s0 + $0x128] sm:$0xff] }
  0xb3   :  { %301 = vst [vmem:[%s896_s3 + $0xb8] sm:$0xff] %v237_v55  ;;  %v119_v19 = vmul.f32 %v374_v1, %v51_v8 }
  0xb5   :  { %v187_v34 = vadd.f32 %v379_v2, %v119_v19 }
  0xb7   :  { %v251_v49 = vmax.f32 %v187_v34, 0.0 }
  0xba   :  { %v52_v12 = vld [vmem:[%s893_s0 + $0x130] sm:$0xff] }
  0xbb   :  { %302 = vst [vmem:[%s896_s3 + $0xc0] sm:$0xff] %v238_v59  ;;  %v120_v23 = vmul.f32 %v374_v1, %v52_v12 }
  0xbd   :  { %v188_v38 = vadd.f32 %v379_v2, %v120_v23 }
  0xbf   :  { %v252_v53 = vmax.f32 %v188_v38, 0.0 }
  0xc2   :  { %v53_v16 = vld [vmem:[%s893_s0 + $0x138] sm:$0xff] }
  0xc3   :  { %303 = vst [vmem:[%s896_s3 + $0xc8] sm:$0xff] %v239_v63  ;;  %v121_v27 = vmul.f32 %v374_v1, %v53_v16 }
  0xc5   :  { %v189_v42 = vadd.f32 %v379_v2, %v121_v27 }
  0xc7   :  { %v253_v57 = vmax.f32 %v189_v42, 0.0 }
  0xca   :  { %v54_v20 = vld [vmem:[%s893_s0 + $0x140] sm:$0xff] }
  0xcb   :  { %304 = vst [vmem:[%s896_s3 + $0xd0] sm:$0xff] %v240_v5  ;;  %v122_v31 = vmul.f32 %v374_v1, %v54_v20 }
  0xcd   :  { %v190_v46 = vadd.f32 %v379_v2, %v122_v31 }
  0xcf   :  { %v254_v61 = vmax.f32 %v190_v46, 0.0 }
  0xd2   :  { %v55_v24 = vld [vmem:[%s893_s0 + $0x148] sm:$0xff] }
  0xd3   :  { %305 = vst [vmem:[%s896_s3 + $0xd8] sm:$0xff] %v241_v9  ;;  %v123_v35 = vmul.f32 %v374_v1, %v55_v24 }
  0xd5   :  { %v191_v50 = vadd.f32 %v379_v2, %v123_v35 }
  0xd7   :  { %v255_v4 = vmax.f32 %v191_v50, 0.0 }
  0xda   :  { %v56_v28 = vld [vmem:[%s893_s0 + $0x150] sm:$0xff] }
  0xdb   :  { %306 = vst [vmem:[%s896_s3 + $0xe0] sm:$0xff] %v242_v13  ;;  %v124_v39 = vmul.f32 %v374_v1, %v56_v28 }
  0xdd   :  { %v192_v54 = vadd.f32 %v379_v2, %v124_v39 }
  0xdf   :  { %v256_v8 = vmax.f32 %v192_v54, 0.0 }
  0xe2   :  { %v57_v32 = vld [vmem:[%s893_s0 + $0x158] sm:$0xff] }
  0xe3   :  { %307 = vst [vmem:[%s896_s3 + $0xe8] sm:$0xff] %v243_v17  ;;  %v125_v43 = vmul.f32 %v374_v1, %v57_v32 }
  0xe5   :  { %v193_v58 = vadd.f32 %v379_v2, %v125_v43 }
  0xe7   :  { %v257_v12 = vmax.f32 %v193_v58, 0.0 }
  0xea   :  { %v58_v36 = vld [vmem:[%s893_s0 + $0x160] sm:$0xff] }
  0xeb   :  { %308 = vst [vmem:[%s896_s3 + $0xf0] sm:$0xff] %v244_v21  ;;  %v126_v47 = vmul.f32 %v374_v1, %v58_v36 }
  0xed   :  { %v194_v62 = vadd.f32 %v379_v2, %v126_v47 }
  0xef   :  { %v258_v17 = vmax.f32 %v194_v62, 0.0 }
  0xf2   :  { %v59_v40 = vld [vmem:[%s893_s0 + $0x168] sm:$0xff] }
  0xf3   :  { %309 = vst [vmem:[%s896_s3 + $0xf8] sm:$0xff] %v245_v25  ;;  %v127_v51 = vmul.f32 %v374_v1, %v59_v40 }
  0xf5   :  { %v195_v5 = vadd.f32 %v379_v2, %v127_v51 }
  0xf7   :  { %v259_v21 = vmax.f32 %v195_v5, 0.0 }
  0xfa   :  { %v60_v44 = vld [vmem:[%s893_s0 + $0x170] sm:$0xff] }
  0xfb   :  { %310 = vst [vmem:[%s896_s3 + $0x100] sm:$0xff] %v246_v29  ;;  %v128_v55 = vmul.f32 %v374_v1, %v60_v44 }
  0xfd   :  { %v196_v9 = vadd.f32 %v379_v2, %v128_v55 }
  0xff   :  { %v260_v26 = vmax.f32 %v196_v9, 0.0 }
 0x102   :  { %v61_v48 = vld [vmem:[%s893_s0 + $0x178] sm:$0xff] }
 0x103   :  { %311 = vst [vmem:[%s896_s3 + $0x108] sm:$0xff] %v247_v33  ;;  %v129_v59 = vmul.f32 %v374_v1, %v61_v48 }
 0x105   :  { %v197_v13 = vadd.f32 %v379_v2, %v129_v59 }
 0x107   :  { %v261_v30 = vmax.f32 %v197_v13, 0.0 }
 0x10a   :  { %v62_v52 = vld [vmem:[%s893_s0 + $0x180] sm:$0xff] }
 0x10b   :  { %312 = vst [vmem:[%s896_s3 + $0x110] sm:$0xff] %v248_v37  ;;  %v130_v63 = vmul.f32 %v374_v1, %v62_v52 }
 0x10d   :  { %v198_v18 = vadd.f32 %v379_v2, %v130_v63 }
 0x10f   :  { %v262_v34 = vmax.f32 %v198_v18, 0.0 }
 0x112   :  { %v63_v56 = vld [vmem:[%s893_s0 + $0x188] sm:$0xff] }
 0x113   :  { %313 = vst [vmem:[%s896_s3 + $0x118] sm:$0xff] %v249_v41  ;;  %v131_v6 = vmul.f32 %v374_v1, %v63_v56 }
 0x115   :  { %v199_v22 = vadd.f32 %v379_v2, %v131_v6 }
 0x117   :  { %v263_v38 = vmax.f32 %v199_v22, 0.0 }
 0x11a   :  { %v64_v60 = vld [vmem:[%s893_s0 + $0x190] sm:$0xff] }
 0x11b   :  { %314 = vst [vmem:[%s896_s3 + $0x120] sm:$0xff] %v250_v45  ;;  %v132_v10 = vmul.f32 %v374_v1, %v64_v60 }
 0x11d   :  { %v200_v27 = vadd.f32 %v379_v2, %v132_v10 }
 0x11f   :  { %v264_v42 = vmax.f32 %v200_v27, 0.0 }
 0x122   :  { %v65_v0 = vld [vmem:[%s893_s0 + $0x198] sm:$0xff] }
 0x123   :  { %v77_v3 = vld [vmem:[%s893_s0 + $0x1f8] sm:$0xff]  ;;  %v133_v14 = vmul.f32 %v374_v1, %v65_v0 }
 0x124   :  { %315 = vst [vmem:[%s896_s3 + $0x128] sm:$0xff] %v251_v49  ;;  %v145_v16 = vmul.f32 %v374_v1, %v77_v3 }
 0x125   :  { %v201_v31 = vadd.f32 %v379_v2, %v133_v14 }
 0x126   :  { %v784_v25 = vadd.f32 %v379_v2, %v145_v16 }
 0x127   :  { %v265_v46 = vmax.f32 %v201_v31, 0.0 }
 0x12b   :  { %v66_v7 = vld [vmem:[%s893_s0 + $0x1a0] sm:$0xff] }
 0x12c   :  { %316 = vst [vmem:[%s896_s3 + $0x130] sm:$0xff] %v252_v53  ;;  %v134_v19 = vmul.f32 %v374_v1, %v66_v7  ;;  %v277_v7 = vmax.f32 %v784_v25, 0.0 }
 0x12e   :  { %v202_v35 = vadd.f32 %v379_v2, %v134_v19 }
 0x130   :  { %v266_v50 = vmax.f32 %v202_v35, 0.0 }
 0x133   :  { %v67_v11 = vld [vmem:[%s893_s0 + $0x1a8] sm:$0xff] }
 0x134   :  { %317 = vst [vmem:[%s896_s3 + $0x138] sm:$0xff] %v253_v57  ;;  %v135_v23 = vmul.f32 %v374_v1, %v67_v11 }
 0x136   :  { %v203_v39 = vadd.f32 %v379_v2, %v135_v23 }
 0x138   :  { %v267_v53 = vmax.f32 %v203_v39, 0.0 }
 0x13b   :  { %v68_v15 = vld [vmem:[%s893_s0 + $0x1b0] sm:$0xff] }
 0x13c   :  { %318 = vst [vmem:[%s896_s3 + $0x140] sm:$0xff] %v254_v61  ;;  %v136_v28 = vmul.f32 %v374_v1, %v68_v15 }
 0x13e   :  { %v204_v43 = vadd.f32 %v379_v2, %v136_v28 }
 0x140   :  { %v268_v56 = vmax.f32 %v204_v43, 0.0 }
 0x143   :  { %v69_v20 = vld [vmem:[%s893_s0 + $0x1b8] sm:$0xff] }
 0x144   :  { %319 = vst [vmem:[%s896_s3 + $0x148] sm:$0xff] %v255_v4  ;;  %v137_v32 = vmul.f32 %v374_v1, %v69_v20 }
 0x146   :  { %v205_v47 = vadd.f32 %v379_v2, %v137_v32 }
 0x148   :  { %v269_v59 = vmax.f32 %v205_v47, 0.0 }
 0x14b   :  { %v70_v24 = vld [vmem:[%s893_s0 + $0x1c0] sm:$0xff] }
 0x14c   :  { %320 = vst [vmem:[%s896_s3 + $0x150] sm:$0xff] %v256_v8  ;;  %v138_v36 = vmul.f32 %v374_v1, %v70_v24 }
 0x14e   :  { %v206_v51 = vadd.f32 %v379_v2, %v138_v36 }
 0x150   :  { %v270_v61 = vmax.f32 %v206_v51, 0.0 }
 0x153   :  { %v71_v29 = vld [vmem:[%s893_s0 + $0x1c8] sm:$0xff] }
 0x154   :  { %321 = vst [vmem:[%s896_s3 + $0x158] sm:$0xff] %v257_v12  ;;  %v139_v40 = vmul.f32 %v374_v1, %v71_v29 }
 0x156   :  { %v207_v54 = vadd.f32 %v379_v2, %v139_v40 }
 0x158   :  { %v271_v63 = vmax.f32 %v207_v54, 0.0 }
 0x15b   :  { %v72_v33 = vld [vmem:[%s893_s0 + $0x1d0] sm:$0xff] }
 0x15c   :  { %322 = vst [vmem:[%s896_s3 + $0x160] sm:$0xff] %v258_v17  ;;  %v140_v44 = vmul.f32 %v374_v1, %v72_v33 }
 0x15e   :  { %v208_v57 = vadd.f32 %v379_v2, %v140_v44 }
 0x160   :  { %v272_v0 = vmax.f32 %v208_v57, 0.0 }
 0x163   :  { %v73_v37 = vld [vmem:[%s893_s0 + $0x1d8] sm:$0xff] }
 0x164   :  { %323 = vst [vmem:[%s896_s3 + $0x168] sm:$0xff] %v259_v21  ;;  %v141_v48 = vmul.f32 %v374_v1, %v73_v37 }
 0x166   :  { %v209_v60 = vadd.f32 %v379_v2, %v141_v48 }
 0x168   :  { %v273_v4 = vmax.f32 %v209_v60, 0.0 }
 0x16b   :  { %v74_v41 = vld [vmem:[%s893_s0 + $0x1e0] sm:$0xff] }
 0x16c   :  { %324 = vst [vmem:[%s896_s3 + $0x170] sm:$0xff] %v260_v26  ;;  %v142_v52 = vmul.f32 %v374_v1, %v74_v41 }
 0x16e   :  { %v210_v62 = vadd.f32 %v379_v2, %v142_v52 }
 0x170   :  { %v274_v5 = vmax.f32 %v210_v62, 0.0 }
 0x173   :  { %v75_v45 = vld [vmem:[%s893_s0 + $0x1e8] sm:$0xff] }
 0x174   :  { %325 = vst [vmem:[%s896_s3 + $0x178] sm:$0xff] %v261_v30  ;;  %v143_v55 = vmul.f32 %v374_v1, %v75_v45 }
 0x17b   :  { %v76_v49 = vld [vmem:[%s893_s0 + $0x1f0] sm:$0xff] }
 0x17c   :  { %326 = vst [vmem:[%s896_s3 + $0x180] sm:$0xff] %v262_v34  ;;  %v144_v58 = vmul.f32 %v374_v1, %v76_v49  ;;  %v211_v1 = vadd.f32 %v379_v2, %v143_v55 }
 0x17d   :  { %327 = vst [vmem:[%s896_s3 + $0x188] sm:$0xff] %v263_v38 }
 0x17e   :  { %328 = vst [vmem:[%s896_s3 + $0x190] sm:$0xff] %v264_v42  ;;  %v212_v3 = vadd.f32 %v379_v2, %v144_v58  ;;  %v275_v6 = vmax.f32 %v211_v1, 0.0 }
 0x17f   :  { %329 = vst [vmem:[%s896_s3 + $0x198] sm:$0xff] %v265_v46 }
 0x180   :  { %330 = vst [vmem:[%s896_s3 + $0x1a0] sm:$0xff] %v266_v50  ;;  %v276_v2 = vmax.f32 %v212_v3, 0.0 }
 0x181   :  { %331 = vst [vmem:[%s896_s3 + $0x1a8] sm:$0xff] %v267_v53 }
 0x182   :  { %332 = vst [vmem:[%s896_s3 + $0x1b0] sm:$0xff] %v268_v56 }
 0x183   :  { %333 = vst [vmem:[%s896_s3 + $0x1b8] sm:$0xff] %v269_v59 }
 0x184   :  { %334 = vst [vmem:[%s896_s3 + $0x1c0] sm:$0xff] %v270_v61 }
 0x185   :  { %335 = vst [vmem:[%s896_s3 + $0x1c8] sm:$0xff] %v271_v63 }
 0x186   :  { %336 = vst [vmem:[%s896_s3 + $0x1d0] sm:$0xff] %v272_v0 }
 0x187   :  { %337 = vst [vmem:[%s896_s3 + $0x1d8] sm:$0xff] %v273_v4 }
 0x188   :  { %338 = vst [vmem:[%s896_s3 + $0x1e0] sm:$0xff] %v274_v5 }
 0x189   :  { %339 = vst [vmem:[%s896_s3 + $0x1e8] sm:$0xff] %v275_v6 }
 0x18a   :  { %340 = vst [vmem:[%s896_s3 + $0x1f0] sm:$0xff] %v276_v2 }
 0x18b   :  { %341 = vst [vmem:[%s896_s3 + $0x1f8] sm:$0xff] %v277_v7 }

// kernel: basic_conv.2
= control target key start
LH: loop header
LB: loop body
LE: loop exit
PB: predicated region body
PF: predicated region fallthrough
CT: control target
= control target key end

     0   :  { %s1703_s1 = inlined_call_operand.vmem [shape: f32[128,128], index: 1, kind: input, shape index: {}]   ;;  %s1704_s0 = inlined_call_operand.vmem [shape: f32[512,128], index: 0, kind: input, shape index: {}]   ;;  %s1705_s2 = inlined_call_operand.vmem [shape: f32[512,128], index: 2, kind: output, shape index: {0}]   ;;  %s1706_s3 = inlined_call_operand.vmem [shape: f32[1,1,128], index: 3, kind: output, shape index: {1}]   ;;  %s1707_s4 = inlined_call_operand.vmem [shape: f32[1,1,128], index: 4, kind: output, shape index: {2}]  }
   0x1   :  { %v225_v0 = vld [vmem:[%s1703_s1 + $0x78] sm:$0xff]  ;;  %v224_v1 = vld [vmem:[%s1703_s1 + $0x70] sm:$0xff]  ;;  %v223_v2 = vld [vmem:[%s1703_s1 + $0x68] sm:$0xff] }
   0x2   :  { %226 = vmatpush.msra.mxu0 %v225_v0  ;;  %910 = vmatpush.msra.mxu1 %v225_v0  ;;  %v222_v3 = vld [vmem:[%s1703_s1 + $0x60] sm:$0xff]  ;;  %v221_v4 = vld [vmem:[%s1703_s1 + $0x58] sm:$0xff]  ;;  %v220_v5 = vld [vmem:[%s1703_s1 + $0x50] sm:$0xff] }
   0x3   :  { %911 = vmatpush.msra.mxu2 %v225_v0  ;;  %912 = vmatpush.msra.mxu3 %v225_v0  ;;  %v219_v6 = vld [vmem:[%s1703_s1 + $0x48] sm:$0xff]  ;;  %v218_v7 = vld [vmem:[%s1703_s1 + $0x40] sm:$0xff]  ;;  %v217_v8 = vld [vmem:[%s1703_s1 + $0x38] sm:$0xff] }
   0x4   :  { %227 = vmatpush.msra.mxu0 %v224_v1  ;;  %913 = vmatpush.msra.mxu1 %v224_v1  ;;  %v216_v9 = vld [vmem:[%s1703_s1 + $0x30] sm:$0xff]  ;;  %v215_v10 = vld [vmem:[%s1703_s1 + $0x28] sm:$0xff]  ;;  %v214_v11 = vld [vmem:[%s1703_s1 + $0x20] sm:$0xff] }
   0x5   :  { %914 = vmatpush.msra.mxu2 %v224_v1  ;;  %915 = vmatpush.msra.mxu3 %v224_v1  ;;  %v213_v12 = vld [vmem:[%s1703_s1 + $0x18] sm:$0xff]  ;;  %v212_v13 = vld [vmem:[%s1703_s1 + $0x10] sm:$0xff]  ;;  %v211_v14 = vld [vmem:[%s1703_s1 + $0x8] sm:$0xff] }
   0x6   :  { %228 = vmatpush.msra.mxu0 %v223_v2  ;;  %916 = vmatpush.msra.mxu1 %v223_v2  ;;  %v210_v15 = vld [vmem:[%s1703_s1] sm:$0xff]  ;;  %v147_v18 = vld [vmem:[%s1704_s0 + $0x8] sm:$0xff]  ;;  %v148_v20 = vld [vmem:[%s1704_s0 + $0x10] sm:$0xff] }
   0x7   :  { %917 = vmatpush.msra.mxu2 %v223_v2  ;;  %918 = vmatpush.msra.mxu3 %v223_v2  ;;  %v146_v16 = vld [vmem:[%s1704_s0] sm:$0xff]  ;;  %v163_v19 = vld [vmem:[%s1704_s0 + $0x88] sm:$0xff]  ;;  %v164_v21 = vld [vmem:[%s1704_s0 + $0x90] sm:$0xff] }
   0x8   :  { %229 = vmatpush.msra.mxu0 %v222_v3  ;;  %919 = vmatpush.msra.mxu1 %v222_v3  ;;  %v162_v17 = vld [vmem:[%s1704_s0 + $0x80] sm:$0xff]  ;;  %v149_v22 = vld [vmem:[%s1704_s0 + $0x18] sm:$0xff]  ;;  %v179_v27 = vld [vmem:[%s1704_s0 + $0x108] sm:$0xff] }
   0x9   :  { %920 = vmatpush.msra.mxu2 %v222_v3  ;;  %921 = vmatpush.msra.mxu3 %v222_v3  ;;  %v165_v23 = vld [vmem:[%s1704_s0 + $0x98] sm:$0xff]  ;;  %v178_v24 = vld [vmem:[%s1704_s0 + $0x100] sm:$0xff]  ;;  %v151_v28 = vld [vmem:[%s1704_s0 + $0x28] sm:$0xff] }
   0xa   :  { %230 = vmatpush.msra.mxu0 %v221_v4  ;;  %922 = vmatpush.msra.mxu1 %v221_v4  ;;  %v150_v25 = vld [vmem:[%s1704_s0 + $0x20] sm:$0xff]  ;;  %v167_v29 = vld [vmem:[%s1704_s0 + $0xa8] sm:$0xff]  ;;  %v180_v30 = vld [vmem:[%s1704_s0 + $0x110] sm:$0xff] }
   0xb   :  { %923 = vmatpush.msra.mxu2 %v221_v4  ;;  %924 = vmatpush.msra.mxu3 %v221_v4  ;;  %v166_v26 = vld [vmem:[%s1704_s0 + $0xa0] sm:$0xff]  ;;  %v152_v31 = vld [vmem:[%s1704_s0 + $0x30] sm:$0xff]  ;;  %v181_v33 = vld [vmem:[%s1704_s0 + $0x118] sm:$0xff] }
   0xc   :  { %231 = vmatpush.msra.mxu0 %v220_v5  ;;  %925 = vmatpush.msra.mxu1 %v220_v5  ;;  %v168_v32 = vld [vmem:[%s1704_s0 + $0xb0] sm:$0xff]  ;;  %v153_v34 = vld [vmem:[%s1704_s0 + $0x38] sm:$0xff]  ;;  %v182_v36 = vld [vmem:[%s1704_s0 + $0x120] sm:$0xff] }
   0xd   :  { %926 = vmatpush.msra.mxu2 %v220_v5  ;;  %927 = vmatpush.msra.mxu3 %v220_v5  ;;  %v169_v35 = vld [vmem:[%s1704_s0 + $0xb8] sm:$0xff]  ;;  %v194_v37 = vld [vmem:[%s1704_s0 + $0x180] sm:$0xff]  ;;  %v183_v40 = vld [vmem:[%s1704_s0 + $0x128] sm:$0xff] }
   0xe   :  { %232 = vmatpush.msra.mxu0 %v219_v6  ;;  %928 = vmatpush.msra.mxu1 %v219_v6  ;;  %v154_v38 = vld [vmem:[%s1704_s0 + $0x40] sm:$0xff]  ;;  %v195_v41 = vld [vmem:[%s1704_s0 + $0x188] sm:$0xff]  ;;  %v184_v44 = vld [vmem:[%s1704_s0 + $0x130] sm:$0xff] }
   0xf   :  { %929 = vmatpush.msra.mxu2 %v219_v6  ;;  %930 = vmatpush.msra.mxu3 %v219_v6  ;;  %v170_v39 = vld [vmem:[%s1704_s0 + $0xc0] sm:$0xff]  ;;  %v155_v42 = vld [vmem:[%s1704_s0 + $0x48] sm:$0xff]  ;;  %v196_v45 = vld [vmem:[%s1704_s0 + $0x190] sm:$0xff] }
  0x10   :  { %233 = vmatpush.msra.mxu0 %v218_v7  ;;  %931 = vmatpush.msra.mxu1 %v218_v7  ;;  %v171_v43 = vld [vmem:[%s1704_s0 + $0xc8] sm:$0xff]  ;;  %v156_v46 = vld [vmem:[%s1704_s0 + $0x50] sm:$0xff]  ;;  %v185_v48 = vld [vmem:[%s1704_s0 + $0x138] sm:$0xff] }
  0x11   :  { %932 = vmatpush.msra.mxu2 %v218_v7  ;;  %933 = vmatpush.msra.mxu3 %v218_v7  ;;  %v172_v47 = vld [vmem:[%s1704_s0 + $0xd0] sm:$0xff]  ;;  %v197_v49 = vld [vmem:[%s1704_s0 + $0x198] sm:$0xff]  ;;  %v186_v52 = vld [vmem:[%s1704_s0 + $0x140] sm:$0xff] }
  0x12   :  { %234 = vmatpush.msra.mxu0 %v217_v8  ;;  %934 = vmatpush.msra.mxu1 %v217_v8  ;;  %v157_v50 = vld [vmem:[%s1704_s0 + $0x58] sm:$0xff]  ;;  %v198_v53 = vld [vmem:[%s1704_s0 + $0x1a0] sm:$0xff]  ;;  %v187_v56 = vld [vmem:[%s1704_s0 + $0x148] sm:$0xff] }
  0x13   :  { %935 = vmatpush.msra.mxu2 %v217_v8  ;;  %936 = vmatpush.msra.mxu3 %v217_v8  ;;  %v173_v51 = vld [vmem:[%s1704_s0 + $0xd8] sm:$0xff]  ;;  %v158_v54 = vld [vmem:[%s1704_s0 + $0x60] sm:$0xff]  ;;  %v199_v57 = vld [vmem:[%s1704_s0 + $0x1a8] sm:$0xff] }
  0x14   :  { %235 = vmatpush.msra.mxu0 %v216_v9  ;;  %937 = vmatpush.msra.mxu1 %v216_v9  ;;  %v174_v55 = vld [vmem:[%s1704_s0 + $0xe0] sm:$0xff]  ;;  %v159_v58 = vld [vmem:[%s1704_s0 + $0x68] sm:$0xff]  ;;  %v188_v60 = vld [vmem:[%s1704_s0 + $0x150] sm:$0xff] }
  0x15   :  { %938 = vmatpush.msra.mxu2 %v216_v9  ;;  %939 = vmatpush.msra.mxu3 %v216_v9  ;;  %v175_v59 = vld [vmem:[%s1704_s0 + $0xe8] sm:$0xff]  ;;  %v200_v61 = vld [vmem:[%s1704_s0 + $0x1b0] sm:$0xff]  ;;  %v189_v0 = vld [vmem:[%s1704_s0 + $0x158] sm:$0xff] }
  0x16   :  { %236 = vmatpush.msra.mxu0 %v215_v10  ;;  %940 = vmatpush.msra.mxu1 %v215_v10  ;;  %v160_v62 = vld [vmem:[%s1704_s0 + $0x70] sm:$0xff]  ;;  %v201_v1 = vld [vmem:[%s1704_s0 + $0x1b8] sm:$0xff]  ;;  %v190_v4 = vld [vmem:[%s1704_s0 + $0x160] sm:$0xff] }
  0x17   :  { %941 = vmatpush.msra.mxu2 %v215_v10  ;;  %942 = vmatpush.msra.mxu3 %v215_v10  ;;  %v176_v63 = vld [vmem:[%s1704_s0 + $0xf0] sm:$0xff]  ;;  %v161_v2 = vld [vmem:[%s1704_s0 + $0x78] sm:$0xff]  ;;  %v202_v5 = vld [vmem:[%s1704_s0 + $0x1c0] sm:$0xff] }
  0x18   :  { %237 = vmatpush.msra.mxu0 %v214_v11  ;;  %943 = vmatpush.msra.mxu1 %v214_v11  ;;  %v177_v3 = vld [vmem:[%s1704_s0 + $0xf8] sm:$0xff]  ;;  %v191_v8 = vld [vmem:[%s1704_s0 + $0x168] sm:$0xff] }
  0x19   :  { %944 = vmatpush.msra.mxu2 %v214_v11  ;;  %945 = vmatpush.msra.mxu3 %v214_v11  ;;  %v203_v9 = vld [vmem:[%s1704_s0 + $0x1c8] sm:$0xff] }
  0x1a   :  { %238 = vmatpush.msra.mxu0 %v213_v12  ;;  %946 = vmatpush.msra.mxu1 %v213_v12 }
  0x1b   :  { %947 = vmatpush.msra.mxu2 %v213_v12  ;;  %948 = vmatpush.msra.mxu3 %v213_v12 }
  0x1c   :  { %239 = vmatpush.msra.mxu0 %v212_v13  ;;  %949 = vmatpush.msra.mxu1 %v212_v13 }
  0x1d   :  { %950 = vmatpush.msra.mxu2 %v212_v13  ;;  %951 = vmatpush.msra.mxu3 %v212_v13 }
  0x1e   :  { %240 = vmatpush.msra.mxu0 %v211_v14  ;;  %952 = vmatpush.msra.mxu1 %v211_v14 }
  0x1f   :  { %953 = vmatpush.msra.mxu2 %v211_v14  ;;  %954 = vmatpush.msra.mxu3 %v211_v14 }
  0x20   :  { %241 = vmatpush.msra.mxu0 %v210_v15  ;;  %955 = vmatpush.msra.mxu1 %v210_v15 }
  0x21   :  { %242 = vmatmul.f32.vlgmr.msra.gmra.mxu0 %v146_v16  ;;  %290 = vmatmul.f32.vlgmr.msra.gmra.mxu1 %v162_v17  ;;  %v192_v16 = vld [vmem:[%s1704_s0 + $0x170] sm:$0xff] }
  0x22   :  { %956 = vmatpush.msra.mxu2 %v210_v15  ;;  %957 = vmatpush.msra.mxu3 %v210_v15  ;;  %v204_v17 = vld [vmem:[%s1704_s0 + $0x1d0] sm:$0xff] }
  0x23   :  { %338 = vmatmul.f32.vlgmr.msra.gmra.mxu2 %v178_v24  ;;  %386 = vmatmul.f32.vlgmr.msra.gmra.mxu3 %v194_v37  ;;  %v205_v24 = vld [vmem:[%s1704_s0 + $0x1d8] sm:$0xff]  ;;  %v207_v37 = vld [vmem:[%s1704_s0 + $0x1e8] sm:$0xff] }
  0x29   :  { %245 = vmatmul.f32.gmra.mxu0 %v147_v18  ;;  %293 = vmatmul.f32.gmra.mxu1 %v163_v19 }
  0x2b   :  { %341 = vmatmul.f32.gmra.mxu2 %v179_v27  ;;  %389 = vmatmul.f32.gmra.mxu3 %v195_v41  ;;  %v208_v41 = vld [vmem:[%s1704_s0 + $0x1f0] sm:$0xff] }
  0x31   :  { %248 = vmatmul.f32.gmra.mxu0 %v148_v20  ;;  %296 = vmatmul.f32.gmra.mxu1 %v164_v21 }
  0x33   :  { %344 = vmatmul.f32.gmra.mxu2 %v180_v30  ;;  %392 = vmatmul.f32.gmra.mxu3 %v196_v45  ;;  %v206_v30 = vld [vmem:[%s1704_s0 + $0x1e0] sm:$0xff]  ;;  %v209_v45 = vld [vmem:[%s1704_s0 + $0x1f8] sm:$0xff] }
  0x39   :  { %251 = vmatmul.f32.gmra.mxu0 %v149_v22  ;;  %299 = vmatmul.f32.gmra.mxu1 %v165_v23  ;;  %v193_v23 = vld [vmem:[%s1704_s0 + $0x178] sm:$0xff] }
  0x3b   :  { %347 = vmatmul.f32.gmra.mxu2 %v181_v33  ;;  %395 = vmatmul.f32.gmra.mxu3 %v197_v49 }
  0x41   :  { %254 = vmatmul.f32.gmra.mxu0 %v150_v25  ;;  %302 = vmatmul.f32.gmra.mxu1 %v166_v26 }
  0x43   :  { %350 = vmatmul.f32.gmra.mxu2 %v182_v36  ;;  %398 = vmatmul.f32.gmra.mxu3 %v198_v53 }
  0x49   :  { %257 = vmatmul.f32.gmra.mxu0 %v151_v28  ;;  %305 = vmatmul.f32.gmra.mxu1 %v167_v29 }
  0x4b   :  { %353 = vmatmul.f32.gmra.mxu2 %v183_v40  ;;  %401 = vmatmul.f32.gmra.mxu3 %v199_v57 }
  0x51   :  { %260 = vmatmul.f32.gmra.mxu0 %v152_v31  ;;  %308 = vmatmul.f32.gmra.mxu1 %v168_v32 }
  0x53   :  { %356 = vmatmul.f32.gmra.mxu2 %v184_v44  ;;  %404 = vmatmul.f32.gmra.mxu3 %v200_v61 }
  0x59   :  { %263 = vmatmul.f32.gmra.mxu0 %v153_v34  ;;  %311 = vmatmul.f32.gmra.mxu1 %v169_v35 }
  0x5b   :  { %359 = vmatmul.f32.gmra.mxu2 %v185_v48  ;;  %407 = vmatmul.f32.gmra.mxu3 %v201_v1 }
  0x61   :  { %266 = vmatmul.f32.gmra.mxu0 %v154_v38  ;;  %314 = vmatmul.f32.gmra.mxu1 %v170_v39 }
  0x63   :  { %362 = vmatmul.f32.gmra.mxu2 %v186_v52  ;;  %410 = vmatmul.f32.gmra.mxu3 %v202_v5 }
  0x69   :  { %269 = vmatmul.f32.gmra.mxu0 %v155_v42  ;;  %317 = vmatmul.f32.gmra.mxu1 %v171_v43 }
  0x6b   :  { %365 = vmatmul.f32.gmra.mxu2 %v187_v56  ;;  %413 = vmatmul.f32.gmra.mxu3 %v203_v9 }
  0x71   :  { %272 = vmatmul.f32.gmra.mxu0 %v156_v46  ;;  %320 = vmatmul.f32.gmra.mxu1 %v172_v47 }
  0x73   :  { %368 = vmatmul.f32.gmra.mxu2 %v188_v60  ;;  %416 = vmatmul.f32.gmra.mxu3 %v204_v17 }
  0x79   :  { %275 = vmatmul.f32.gmra.mxu0 %v157_v50  ;;  %323 = vmatmul.f32.gmra.mxu1 %v173_v51 }
  0x7b   :  { %371 = vmatmul.f32.gmra.mxu2 %v189_v0  ;;  %419 = vmatmul.f32.gmra.mxu3 %v205_v24 }
  0x81   :  { %278 = vmatmul.f32.gmra.mxu0 %v158_v54  ;;  %326 = vmatmul.f32.gmra.mxu1 %v174_v55 }
  0x83   :  { %374 = vmatmul.f32.gmra.mxu2 %v190_v4  ;;  %422 = vmatmul.f32.gmra.mxu3 %v206_v30 }
  0x89   :  { %281 = vmatmul.f32.gmra.mxu0 %v159_v58  ;;  %329 = vmatmul.f32.gmra.mxu1 %v175_v59 }
  0x8b   :  { %377 = vmatmul.f32.gmra.mxu2 %v191_v8  ;;  %425 = vmatmul.f32.gmra.mxu3 %v207_v37 }
  0x91   :  { %284 = vmatmul.f32.gmra.mxu0 %v160_v62  ;;  %332 = vmatmul.f32.gmra.mxu1 %v176_v63 }
  0x93   :  { %380 = vmatmul.f32.gmra.mxu2 %v192_v16  ;;  %428 = vmatmul.f32.gmra.mxu3 %v208_v41 }
  0x99   :  { %287 = vmatmul.f32.gmra.mxu0 %v161_v2  ;;  %335 = vmatmul.f32.gmra.mxu1 %v177_v3 }
  0x9b   :  { %383 = vmatmul.f32.gmra.mxu2 %v193_v23  ;;  %431 = vmatmul.f32.gmra.mxu3 %v209_v45 }
  0x9e   :  { %v243_v6 = vpop.f32.mrf.mxu0  ;;  %v1193_v7 = vpop.f32.mrf.mxu1 }
  0x9f   :  { %630 = vst [vmem:[%s1705_s2] sm:$0xff] %v243_v6  ;;  %v764_v12 = vmul.f32 %v243_v6, %v243_v6 }
  0xa0   :  { %646 = vst [vmem:[%s1705_s2 + $0x80] sm:$0xff] %v1193_v7 }
  0xa6   :  { %v246_v10 = vpop.f32.mrf.mxu0  ;;  %v1208_v11 = vpop.f32.mrf.mxu1 }
  0xa7   :  { %631 = vst [vmem:[%s1705_s2 + $0x8] sm:$0xff] %v246_v10  ;;  %v694_v13 = vadd.f32 %v246_v10, %v243_v6  ;;  %v765_v14 = vmul.f32 %v246_v10, %v246_v10  ;;  %v1257_v35 = vpop.f32.mrf.mxu2  ;;  %v1333_v52 = vpop.f32.mrf.mxu3 }
  0xa8   :  { %647 = vst [vmem:[%s1705_s2 + $0x88] sm:$0xff] %v1208_v11 }
  0xa9   :  { %v828_v15 = vadd.f32 %v765_v14, %v764_v12  ;;  %662 = vst [vmem:[%s1705_s2 + $0x100] sm:$0xff] %v1257_v35 }
  0xaa   :  { %678 = vst [vmem:[%s1705_s2 + $0x180] sm:$0xff] %v1333_v52 }
  0xae   :  { %v249_v18 = vpop.f32.mrf.mxu0  ;;  %v1223_v19 = vpop.f32.mrf.mxu1 }
  0xaf   :  { %632 = vst [vmem:[%s1705_s2 + $0x10] sm:$0xff] %v249_v18  ;;  %v695_v20 = vadd.f32 %v694_v13, %v249_v18  ;;  %v766_v21 = vmul.f32 %v249_v18, %v249_v18  ;;  %v1280_v40 = vpop.f32.mrf.mxu2  ;;  %v1354_v56 = vpop.f32.mrf.mxu3 }
  0xb0   :  { %648 = vst [vmem:[%s1705_s2 + $0x90] sm:$0xff] %v1223_v19 }
  0xb1   :  { %v829_v22 = vadd.f32 %v828_v15, %v766_v21  ;;  %663 = vst [vmem:[%s1705_s2 + $0x108] sm:$0xff] %v1280_v40 }
  0xb2   :  { %679 = vst [vmem:[%s1705_s2 + $0x188] sm:$0xff] %v1354_v56 }
  0xb6   :  { %v252_v25 = vpop.f32.mrf.mxu0  ;;  %v1238_v26 = vpop.f32.mrf.mxu1 }
  0xb7   :  { %633 = vst [vmem:[%s1705_s2 + $0x18] sm:$0xff] %v252_v25  ;;  %v696_v27 = vadd.f32 %v695_v20, %v252_v25  ;;  %v767_v28 = vmul.f32 %v252_v25, %v252_v25  ;;  %v1298_v44 = vpop.f32.mrf.mxu2  ;;  %v1375_v60 = vpop.f32.mrf.mxu3 }
  0xb8   :  { %649 = vst [vmem:[%s1705_s2 + $0x98] sm:$0xff] %v1238_v26 }
  0xb9   :  { %v830_v29 = vadd.f32 %v829_v22, %v767_v28  ;;  %664 = vst [vmem:[%s1705_s2 + $0x110] sm:$0xff] %v1298_v44 }
  0xba   :  { %680 = vst [vmem:[%s1705_s2 + $0x190] sm:$0xff] %v1375_v60 }
  0xbe   :  { %v255_v31 = vpop.f32.mrf.mxu0  ;;  %v1250_v32 = vpop.f32.mrf.mxu1 }
  0xbf   :  { %634 = vst [vmem:[%s1705_s2 + $0x20] sm:$0xff] %v255_v31  ;;  %v1255_v33 = vadd.f32 %v696_v27, %v255_v31  ;;  %v768_v34 = vmul.f32 %v255_v31, %v255_v31  ;;  %v1316_v48 = vpop.f32.mrf.mxu2  ;;  %v1396_v0 = vpop.f32.mrf.mxu3 }
  0xc0   :  { %650 = vst [vmem:[%s1705_s2 + $0xa0] sm:$0xff] %v1250_v32 }
  0xc1   :  { %v1263_v36 = vadd.f32 %v830_v29, %v768_v34  ;;  %665 = vst [vmem:[%s1705_s2 + $0x118] sm:$0xff] %v1316_v48 }
  0xc2   :  { %681 = vst [vmem:[%s1705_s2 + $0x198] sm:$0xff] %v1396_v0 }
  0xc6   :  { %v1272_v38 = vpop.f32.mrf.mxu0  ;;  %v1274_v39 = vpop.f32.mrf.mxu1 }
  0xc7   :  { %635 = vst [vmem:[%s1705_s2 + $0x28] sm:$0xff] %v1272_v38  ;;  %v1331_v51 = vpop.f32.mrf.mxu2  ;;  %v1417_v4 = vpop.f32.mrf.mxu3  ;;  %v769_v5 = vmul.f32 %v1272_v38, %v1272_v38  ;;  %v698_v6 = vadd.f32 %v1255_v33, %v1272_v38 }
  0xc8   :  { %651 = vst [vmem:[%s1705_s2 + $0xa8] sm:$0xff] %v1274_v39 }
  0xc9   :  { %666 = vst [vmem:[%s1705_s2 + $0x120] sm:$0xff] %v1331_v51  ;;  %v832_v9 = vadd.f32 %v1263_v36, %v769_v5 }
  0xca   :  { %682 = vst [vmem:[%s1705_s2 + $0x1a0] sm:$0xff] %v1417_v4 }
  0xce   :  { %v261_v42 = vpop.f32.mrf.mxu0  ;;  %v1293_v43 = vpop.f32.mrf.mxu1 }
  0xcf   :  { %636 = vst [vmem:[%s1705_s2 + $0x30] sm:$0xff] %v261_v42  ;;  %v1352_v55 = vpop.f32.mrf.mxu2  ;;  %v770_v8 = vmul.f32 %v261_v42, %v261_v42  ;;  %v699_v10 = vadd.f32 %v698_v6, %v261_v42  ;;  %v1443_v20 = vpop.f32.mrf.mxu3 }
  0xd0   :  { %652 = vst [vmem:[%s1705_s2 + $0xb0] sm:$0xff] %v1293_v43 }
  0xd1   :  { %667 = vst [vmem:[%s1705_s2 + $0x128] sm:$0xff] %v1352_v55  ;;  %v833_v15 = vadd.f32 %v832_v9, %v770_v8 }
  0xd2   :  { %683 = vst [vmem:[%s1705_s2 + $0x1a8] sm:$0xff] %v1443_v20 }
  0xd6   :  { %v264_v46 = vpop.f32.mrf.mxu0  ;;  %v1311_v47 = vpop.f32.mrf.mxu1 }
  0xd7   :  { %637 = vst [vmem:[%s1705_s2 + $0x38] sm:$0xff] %v264_v46  ;;  %v1373_v59 = vpop.f32.mrf.mxu2  ;;  %v771_v12 = vmul.f32 %v264_v46, %v264_v46  ;;  %v700_v16 = vadd.f32 %v699_v10, %v264_v46  ;;  %v1464_v41 = vpop.f32.mrf.mxu3 }
  0xd8   :  { %653 = vst [vmem:[%s1705_s2 + $0xb8] sm:$0xff] %v1311_v47 }
  0xd9   :  { %668 = vst [vmem:[%s1705_s2 + $0x130] sm:$0xff] %v1373_v59  ;;  %v834_v21 = vadd.f32 %v833_v15, %v771_v12 }
  0xda   :  { %684 = vst [vmem:[%s1705_s2 + $0x1b0] sm:$0xff] %v1464_v41 }
  0xde   :  { %v267_v49 = vpop.f32.mrf.mxu0  ;;  %v1326_v50 = vpop.f32.mrf.mxu1 }
  0xdf   :  { %638 = vst [vmem:[%s1705_s2 + $0x40] sm:$0xff] %v267_v49  ;;  %v1394_v63 = vpop.f32.mrf.mxu2  ;;  %v772_v17 = vmul.f32 %v267_v49, %v267_v49  ;;  %v701_v22 = vadd.f32 %v700_v16, %v267_v49  ;;  %v1485_v15 = vpop.f32.mrf.mxu3 }
  0xe0   :  { %654 = vst [vmem:[%s1705_s2 + $0xc0] sm:$0xff] %v1326_v50 }
  0xe1   :  { %669 = vst [vmem:[%s1705_s2 + $0x138] sm:$0xff] %v1394_v63  ;;  %v835_v24 = vadd.f32 %v834_v21, %v772_v17  ;;  %v781_v21 = vmul.f32 %v1208_v11, %v1208_v11 }
  0xe2   :  { %685 = vst [vmem:[%s1705_s2 + $0x1b8] sm:$0xff] %v1485_v15 }
  0xe6   :  { %v270_v53 = vpop.f32.mrf.mxu0  ;;  %v1347_v54 = vpop.f32.mrf.mxu1 }
  0xe7   :  { %639 = vst [vmem:[%s1705_s2 + $0x48] sm:$0xff] %v270_v53  ;;  %v1415_v3 = vpop.f32.mrf.mxu2  ;;  %v773_v23 = vmul.f32 %v270_v53, %v270_v53  ;;  %v702_v25 = vadd.f32 %v701_v22, %v270_v53 }
  0xe8   :  { %655 = vst [vmem:[%s1705_s2 + $0xc8] sm:$0xff] %v1347_v54 }
  0xe9   :  { %670 = vst [vmem:[%s1705_s2 + $0x140] sm:$0xff] %v1415_v3  ;;  %v836_v28 = vadd.f32 %v835_v24, %v773_v23 }
  0xee   :  { %v273_v57 = vpop.f32.mrf.mxu0  ;;  %v1368_v58 = vpop.f32.mrf.mxu1 }
  0xef   :  { %640 = vst [vmem:[%s1705_s2 + $0x50] sm:$0xff] %v273_v57  ;;  %v1441_v18 = vpop.f32.mrf.mxu2  ;;  %v774_v27 = vmul.f32 %v273_v57, %v273_v57  ;;  %v703_v29 = vadd.f32 %v702_v25, %v273_v57 }
  0xf0   :  { %656 = vst [vmem:[%s1705_s2 + $0xd0] sm:$0xff] %v1368_v58 }
  0xf1   :  { %671 = vst [vmem:[%s1705_s2 + $0x148] sm:$0xff] %v1441_v18  ;;  %v837_v34 = vadd.f32 %v836_v28, %v774_v27  ;;  %v783_v27 = vmul.f32 %v1238_v26, %v1238_v26 }
  0xf6   :  { %v276_v61 = vpop.f32.mrf.mxu0  ;;  %v1389_v62 = vpop.f32.mrf.mxu1 }
  0xf7   :  { %641 = vst [vmem:[%s1705_s2 + $0x58] sm:$0xff] %v276_v61  ;;  %v775_v30 = vmul.f32 %v276_v61, %v276_v61  ;;  %v704_v36 = vadd.f32 %v703_v29, %v276_v61  ;;  %v1462_v38 = vpop.f32.mrf.mxu2 }
  0xf8   :  { %657 = vst [vmem:[%s1705_s2 + $0xd8] sm:$0xff] %v1389_v62 }
  0xf9   :  { %v838_v42 = vadd.f32 %v837_v34, %v775_v30  ;;  %672 = vst [vmem:[%s1705_s2 + $0x150] sm:$0xff] %v1462_v38 }
  0xfe   :  { %v279_v1 = vpop.f32.mrf.mxu0  ;;  %v1410_v2 = vpop.f32.mrf.mxu1 }
  0xff   :  { %642 = vst [vmem:[%s1705_s2 + $0x60] sm:$0xff] %v279_v1  ;;  %v776_v37 = vmul.f32 %v279_v1, %v279_v1  ;;  %v705_v45 = vadd.f32 %v704_v36, %v279_v1  ;;  %v1483_v12 = vpop.f32.mrf.mxu2 }
 0x100   :  { %658 = vst [vmem:[%s1705_s2 + $0xe0] sm:$0xff] %v1410_v2 }
 0x101   :  { %v839_v49 = vadd.f32 %v838_v42, %v776_v37  ;;  %673 = vst [vmem:[%s1705_s2 + $0x158] sm:$0xff] %v1483_v12  ;;  %v786_v42 = vmul.f32 %v1293_v43, %v1293_v43 }
 0x106   :  { %v282_v13 = vpop.f32.mrf.mxu0  ;;  %v1436_v14 = vpop.f32.mrf.mxu1 }
 0x107   :  { %643 = vst [vmem:[%s1705_s2 + $0x68] sm:$0xff] %v282_v13  ;;  %v777_v46 = vmul.f32 %v282_v13, %v282_v13  ;;  %v706_v53 = vadd.f32 %v705_v45, %v282_v13  ;;  %v780_v13 = vmul.f32 %v1193_v7, %v1193_v7  ;;  %v1511_v30 = vpop.f32.mrf.mxu2 }
 0x108   :  { %659 = vst [vmem:[%s1705_s2 + $0xe8] sm:$0xff] %v1436_v14 }
 0x109   :  { %v840_v61 = vadd.f32 %v839_v49, %v777_v46  ;;  %674 = vst [vmem:[%s1705_s2 + $0x160] sm:$0xff] %v1511_v30 }
 0x10e   :  { %v285_v31 = vpop.f32.mrf.mxu0  ;;  %v1457_v33 = vpop.f32.mrf.mxu1 }
 0x10f   :  { %644 = vst [vmem:[%s1705_s2 + $0x70] sm:$0xff] %v285_v31  ;;  %v778_v57 = vmul.f32 %v285_v31, %v285_v31  ;;  %v707_v5 = vadd.f32 %v706_v53, %v285_v31  ;;  %v1513_v31 = vpop.f32.mrf.mxu3 }
 0x110   :  { %660 = vst [vmem:[%s1705_s2 + $0xf0] sm:$0xff] %v1457_v33 }
 0x111   :  { %v841_v1 = vadd.f32 %v840_v61, %v778_v57  ;;  %686 = vst [vmem:[%s1705_s2 + $0x1c0] sm:$0xff] %v1513_v31  ;;  %v1535_v57 = vpop.f32.mrf.mxu2 }
 0x112   :  { %675 = vst [vmem:[%s1705_s2 + $0x168] sm:$0xff] %v1535_v57 }
 0x116   :  { %v288_v6 = vpop.f32.mrf.mxu0  ;;  %v1478_v8 = vpop.f32.mrf.mxu1 }
 0x117   :  { %645 = vst [vmem:[%s1705_s2 + $0x78] sm:$0xff] %v288_v6  ;;  %v708_v9 = vadd.f32 %v707_v5, %v288_v6  ;;  %v779_v10 = vmul.f32 %v288_v6, %v288_v6  ;;  %v1537_v61 = vpop.f32.mrf.mxu3 }
 0x118   :  { %661 = vst [vmem:[%s1705_s2 + $0xf8] sm:$0xff] %v1478_v8 }
 0x119   :  { %v709_v16 = vadd.f32 %v708_v9, %v1193_v7  ;;  %v842_v17 = vadd.f32 %v841_v1, %v779_v10  ;;  %v782_v7 = vmul.f32 %v1223_v19, %v1223_v19  ;;  %687 = vst [vmem:[%s1705_s2 + $0x1c8] sm:$0xff] %v1537_v61  ;;  %v790_v9 = vmul.f32 %v1368_v58, %v1368_v58 }
 0x11b   :  { %v710_v22 = vadd.f32 %v709_v16, %v1208_v11  ;;  %v843_v23 = vadd.f32 %v842_v17, %v780_v13  ;;  %v784_v11 = vmul.f32 %v1250_v32, %v1250_v32  ;;  %v791_v16 = vmul.f32 %v1389_v62, %v1389_v62 }
 0x11d   :  { %v711_v24 = vadd.f32 %v710_v22, %v1223_v19  ;;  %v844_v25 = vadd.f32 %v843_v23, %v781_v21  ;;  %v1559_v21 = vpop.f32.mrf.mxu2 }
 0x11e   :  { %676 = vst [vmem:[%s1705_s2 + $0x170] sm:$0xff] %v1559_v21 }
 0x11f   :  { %v712_v28 = vadd.f32 %v711_v24, %v1238_v26  ;;  %v845_v29 = vadd.f32 %v844_v25, %v782_v7  ;;  %v785_v26 = vmul.f32 %v1274_v39, %v1274_v39  ;;  %v1561_v22 = vpop.f32.mrf.mxu3  ;;  %v793_v24 = vmul.f32 %v1436_v14, %v1436_v14 }
 0x120   :  { %688 = vst [vmem:[%s1705_s2 + $0x1d0] sm:$0xff] %v1561_v22 }
 0x121   :  { %v713_v19 = vadd.f32 %v712_v28, %v1250_v32  ;;  %v846_v34 = vadd.f32 %v845_v29, %v783_v27  ;;  %v787_v32 = vmul.f32 %v1311_v47, %v1311_v47  ;;  %v794_v28 = vmul.f32 %v1457_v33, %v1457_v33 }
 0x123   :  { %v714_v36 = vadd.f32 %v713_v19, %v1274_v39  ;;  %v847_v37 = vadd.f32 %v846_v34, %v784_v11  ;;  %v788_v39 = vmul.f32 %v1326_v50, %v1326_v50 }
 0x125   :  { %v848_v45 = vadd.f32 %v847_v37, %v785_v26  ;;  %v715_v46 = vadd.f32 %v714_v36, %v1293_v43  ;;  %v384_v19 = vpop.f32.mrf.mxu2 }
 0x126   :  { %677 = vst [vmem:[%s1705_s2 + $0x178] sm:$0xff] %v384_v19 }
 0x127   :  { %v716_v49 = vadd.f32 %v715_v46, %v1311_v47  ;;  %v849_v53 = vadd.f32 %v848_v45, %v786_v42  ;;  %v789_v47 = vmul.f32 %v1347_v54, %v1347_v54  ;;  %v1583_v34 = vpop.f32.mrf.mxu3  ;;  %v798_v42 = vmul.f32 %v1298_v44, %v1298_v44 }
 0x128   :  { %689 = vst [vmem:[%s1705_s2 + $0x1d8] sm:$0xff] %v1583_v34 }
 0x129   :  { %v717_v43 = vadd.f32 %v716_v49, %v1326_v50  ;;  %v850_v5 = vadd.f32 %v849_v53, %v787_v32 }
 0x12b   :  { %v718_v6 = vadd.f32 %v717_v43, %v1347_v54  ;;  %v851_v1 = vadd.f32 %v850_v5, %v788_v39  ;;  %v801_v43 = vmul.f32 %v1352_v55, %v1352_v55 }
 0x12d   :  { %v719_v10 = vadd.f32 %v718_v6, %v1368_v58  ;;  %v852_v13 = vadd.f32 %v851_v1, %v789_v47  ;;  %v792_v58 = vmul.f32 %v1410_v2, %v1410_v2  ;;  %v802_v47 = vmul.f32 %v1373_v59, %v1373_v59 }
 0x12f   :  { %v720_v50 = vadd.f32 %v719_v10, %v1389_v62  ;;  %v853_v17 = vadd.f32 %v852_v13, %v790_v9  ;;  %v1604_v53 = vpop.f32.mrf.mxu3  ;;  %v803_v9 = vmul.f32 %v1394_v63, %v1394_v63 }
 0x130   :  { %690 = vst [vmem:[%s1705_s2 + $0x1e0] sm:$0xff] %v1604_v53 }
 0x131   :  { %v854_v54 = vadd.f32 %v853_v17, %v791_v16  ;;  %v721_v23 = vadd.f32 %v720_v50, %v1410_v2  ;;  %v795_v2 = vmul.f32 %v1478_v8, %v1478_v8 }
 0x133   :  { %v855_v62 = vadd.f32 %v854_v54, %v792_v58  ;;  %v722_v7 = vadd.f32 %v721_v23, %v1436_v14  ;;  %v796_v14 = vmul.f32 %v1257_v35, %v1257_v35  ;;  %v806_v54 = vmul.f32 %v1462_v38, %v1462_v38 }
 0x135   :  { %v856_v25 = vadd.f32 %v855_v62, %v793_v24  ;;  %v723_v27 = vadd.f32 %v722_v7, %v1457_v33  ;;  %v797_v33 = vmul.f32 %v1280_v40, %v1280_v40  ;;  %v807_v7 = vmul.f32 %v1483_v12, %v1483_v12 }
 0x137   :  { %v857_v29 = vadd.f32 %v856_v25, %v794_v28  ;;  %v724_v11 = vadd.f32 %v723_v27, %v1478_v8  ;;  %v808_v27 = vmul.f32 %v1511_v30, %v1511_v30 }
 0x139   :  { %v725_v26 = vadd.f32 %v724_v11, %v1257_v35  ;;  %v858_v36 = vadd.f32 %v857_v29, %v795_v2  ;;  %v799_v35 = vmul.f32 %v1316_v48, %v1316_v48  ;;  %v809_v2 = vmul.f32 %v1535_v57, %v1535_v57 }
 0x13a   :  { %v810_v11 = vmul.f32 %v1559_v21, %v1559_v21 }
 0x13b   :  { %v726_v8 = vadd.f32 %v725_v26, %v1280_v40  ;;  %v859_v37 = vadd.f32 %v858_v36, %v796_v14  ;;  %v800_v40 = vmul.f32 %v1331_v51, %v1331_v51  ;;  %v811_v14 = vmul.f32 %v384_v19, %v384_v19 }
 0x13d   :  { %v727_v45 = vadd.f32 %v726_v8, %v1298_v44  ;;  %v860_v46 = vadd.f32 %v859_v37, %v797_v33  ;;  %v813_v37 = vmul.f32 %v1354_v56, %v1354_v56 }
 0x13f   :  { %v728_v32 = vadd.f32 %v727_v45, %v1316_v48  ;;  %v861_v49 = vadd.f32 %v860_v46, %v798_v42 }
 0x141   :  { %v729_v39 = vadd.f32 %v728_v32, %v1331_v51  ;;  %v862_v44 = vadd.f32 %v861_v49, %v799_v35  ;;  %v1622_v51 = vpop.f32.mrf.mxu3  ;;  %v815_v35 = vmul.f32 %v1396_v0, %v1396_v0 }
 0x142   :  { %691 = vst [vmem:[%s1705_s2 + $0x1e8] sm:$0xff] %v1622_v51 }
 0x143   :  { %v730_v5 = vadd.f32 %v729_v39, %v1352_v55  ;;  %v863_v48 = vadd.f32 %v862_v44, %v800_v40  ;;  %v804_v55 = vmul.f32 %v1415_v3, %v1415_v3 }
 0x145   :  { %v864_v6 = vadd.f32 %v863_v48, %v801_v43  ;;  %v731_v1 = vadd.f32 %v730_v5, %v1373_v59  ;;  %v805_v59 = vmul.f32 %v1441_v18, %v1441_v18 }
 0x147   :  { %v732_v10 = vadd.f32 %v731_v1, %v1394_v63  ;;  %v865_v13 = vadd.f32 %v864_v6, %v802_v47 }
 0x149   :  { %v733_v50 = vadd.f32 %v732_v10, %v1415_v3  ;;  %v866_v16 = vadd.f32 %v865_v13, %v803_v9  ;;  %v429_v3 = vpop.f32.mrf.mxu3 }
 0x14a   :  { %692 = vst [vmem:[%s1705_s2 + $0x1f0] sm:$0xff] %v429_v3 }
 0x14b   :  { %v734_v17 = vadd.f32 %v733_v50, %v1441_v18  ;;  %v867_v63 = vadd.f32 %v866_v16, %v804_v55  ;;  %v823_v16 = vmul.f32 %v1583_v34, %v1583_v34 }
 0x14d   :  { %v735_v23 = vadd.f32 %v734_v17, %v1462_v38  ;;  %v868_v58 = vadd.f32 %v867_v63, %v805_v59  ;;  %v824_v63 = vmul.f32 %v1604_v53, %v1604_v53 }
 0x14f   :  { %v736_v62 = vadd.f32 %v735_v23, %v1483_v12  ;;  %v869_v24 = vadd.f32 %v868_v58, %v806_v54  ;;  %v825_v23 = vmul.f32 %v1622_v51, %v1622_v51 }
 0x151   :  { %v870_v25 = vadd.f32 %v869_v24, %v807_v7  ;;  %v737_v18 = vadd.f32 %v736_v62, %v1511_v30  ;;  %v432_v33 = vpop.f32.mrf.mxu3  ;;  %v812_v30 = vmul.f32 %v1333_v52, %v1333_v52  ;;  %v826_v62 = vmul.f32 %v429_v3, %v429_v3 }
 0x152   :  { %693 = vst [vmem:[%s1705_s2 + $0x1f8] sm:$0xff] %v432_v33  ;;  %v827_v7 = vmul.f32 %v432_v33, %v432_v33 }
 0x153   :  { %v871_v28 = vadd.f32 %v870_v25, %v808_v27  ;;  %v738_v38 = vadd.f32 %v737_v18, %v1535_v57 }
 0x155   :  { %v872_v29 = vadd.f32 %v871_v28, %v809_v2  ;;  %v739_v12 = vadd.f32 %v738_v38, %v1559_v21 }
 0x157   :  { %v873_v26 = vadd.f32 %v872_v29, %v810_v11  ;;  %v740_v36 = vadd.f32 %v739_v12, %v384_v19  ;;  %v814_v19 = vmul.f32 %v1375_v60, %v1375_v60 }
 0x159   :  { %v741_v8 = vadd.f32 %v740_v36, %v1333_v52  ;;  %v874_v57 = vadd.f32 %v873_v26, %v811_v14  ;;  %v816_v52 = vmul.f32 %v1417_v4, %v1417_v4 }
 0x15b   :  { %v742_v42 = vadd.f32 %v741_v8, %v1354_v56  ;;  %v875_v21 = vadd.f32 %v874_v57, %v812_v30  ;;  %v817_v56 = vmul.f32 %v1443_v20, %v1443_v20 }
 0x15d   :  { %v743_v45 = vadd.f32 %v742_v42, %v1375_v60  ;;  %v876_v46 = vadd.f32 %v875_v21, %v813_v37  ;;  %v818_v60 = vmul.f32 %v1464_v41, %v1464_v41 }
 0x15f   :  { %v744_v32 = vadd.f32 %v743_v45, %v1396_v0  ;;  %v877_v49 = vadd.f32 %v876_v46, %v814_v19  ;;  %v819_v0 = vmul.f32 %v1485_v15, %v1485_v15 }
 0x161   :  { %v745_v40 = vadd.f32 %v744_v32, %v1417_v4  ;;  %v878_v39 = vadd.f32 %v877_v49, %v815_v35  ;;  %v820_v4 = vmul.f32 %v1513_v31, %v1513_v31 }
 0x163   :  { %v746_v44 = vadd.f32 %v745_v40, %v1443_v20  ;;  %v879_v43 = vadd.f32 %v878_v39, %v816_v52  ;;  %v821_v20 = vmul.f32 %v1537_v61, %v1537_v61 }
 0x165   :  { %v880_v5 = vadd.f32 %v879_v43, %v817_v56  ;;  %v747_v48 = vadd.f32 %v746_v44, %v1464_v41  ;;  %v822_v41 = vmul.f32 %v1561_v22, %v1561_v22 }
 0x167   :  { %v748_v47 = vadd.f32 %v747_v48, %v1485_v15  ;;  %v881_v6 = vadd.f32 %v880_v5, %v818_v60 }
 0x169   :  { %v749_v1 = vadd.f32 %v748_v47, %v1513_v31  ;;  %v882_v9 = vadd.f32 %v881_v6, %v819_v0 }
 0x16b   :  { %v750_v10 = vadd.f32 %v749_v1, %v1537_v61  ;;  %v883_v13 = vadd.f32 %v882_v9, %v820_v4 }
 0x16d   :  { %v751_v55 = vadd.f32 %v750_v10, %v1561_v22  ;;  %v884_v50 = vadd.f32 %v883_v13, %v821_v20 }
 0x16f   :  { %v752_v15 = vadd.f32 %v751_v55, %v1583_v34  ;;  %v885_v59 = vadd.f32 %v884_v50, %v822_v41 }
 0x171   :  { %v886_v31 = vadd.f32 %v885_v59, %v823_v16  ;;  %v753_v17 = vadd.f32 %v752_v15, %v1604_v53 }
 0x173   :  { %v887_v61 = vadd.f32 %v886_v31, %v824_v63  ;;  %v754_v54 = vadd.f32 %v753_v17, %v1622_v51 }
 0x175   :  { %v888_v22 = vadd.f32 %v887_v61, %v825_v23  ;;  %v755_v58 = vadd.f32 %v754_v54, %v429_v3 }
 0x177   :  { %v889_v24 = vadd.f32 %v888_v22, %v826_v62  ;;  %v756_v25 = vadd.f32 %v755_v58, %v432_v33 }
 0x179   :  { %v757_v34 = vrot.slane %v756_v25, 4  ;;  %v890_v18 = vadd.f32 %v889_v24, %v827_v7 }
 0x17b   :  { %v758_v27 = vadd.f32 %v757_v34, %v756_v25  ;;  %v891_v28 = vrot.slane %v890_v18, 4 }
 0x17d   :  { %v759_v38 = vrot.slane %v758_v27, 2  ;;  %v892_v2 = vadd.f32 %v891_v28, %v890_v18 }
 0x17f   :  { %v760_v29 = vadd.f32 %v759_v38, %v758_v27  ;;  %v893_v53 = vrot.slane %v892_v2, 2 }
 0x181   :  { %v761_v12 = vrot.slane %v760_v29, 1  ;;  %v894_v11 = vadd.f32 %v893_v53, %v892_v2 }
 0x183   :  { %v762_v14 = vadd.f32 %v761_v12, %v760_v29  ;;  %v895_v26 = vrot.slane %v894_v11, 1 }
 0x185   :  { %763 = vst [vmem:[%s1706_s3] sm:$0x1] %v762_v14  ;;  %v896_v51 = vadd.f32 %v895_v26, %v894_v11 }
 0x187   :  { %897 = vst [vmem:[%s1707_s4] sm:$0x1] %v896_v51 }

</bundles_post_ra>
